<compile_context>
chip_gen: v7x
topology: tpu7x:2x2x1
jax: 0.10.0
libtpu: 0.0.40
codegen_flags: <defaults>
</compile_context>

<pallas_src>
import functools

import jax
import jax.numpy as jnp
from jax.experimental import pallas as pl
from jax.experimental.pallas import tpu as pltpu

EPS = 1e-5


def _bn_relu_conv1x1_kernel(x_ref, gamma_ref, beta_ref, w_ref, o_ref, *, inv_count):
    # x_ref:      (P_pad, Cin)  pixels-major; rows >= true pixel count are zero padding
    # gamma/beta: (1, Cin)      lane-dense per-channel affine params
    # w_ref:      (Cin, Ct)     one Cout tile of the (Cin, Cout) weight
    # o_ref:      (P_pad, Ct)   lane-dense output tile (last dim multiple of 128)
    x = x_ref[...]

    # One-pass BN stats: sum and sum-of-squares over the pixel axis, divided by
    # the TRUE pixel count (padded rows are zeros and contribute nothing).
    s = jnp.sum(x, axis=0, keepdims=True)
    ss = jnp.sum(x * x, axis=0, keepdims=True)
    mean = s * inv_count
    var = ss * inv_count - mean * mean          # biased variance (training mode)
    inv_std = jax.lax.rsqrt(var + EPS)

    # Fold BN into a single scale/shift, then fuse with ReLU in one VPU pass.
    scale = inv_std * gamma_ref[...]            # (1, Cin)
    shift = beta_ref[...] - mean * scale        # (1, Cin)
    xr = jnp.maximum(x * scale + shift, 0.0)    # (P_pad, Cin)

    # 1x1 conv == (P_pad, Cin) @ (Cin, Ct) on the MXU.  Garbage in the padded
    # output rows is confined to rows >= P and sliced off by the wrapper.
    o_ref[...] = jnp.dot(xr, w_ref[...], preferred_element_type=jnp.float32)


def bn_relu_conv1x1(x_nchw, w_oi, gamma, beta, *, cout_tiles=4):
    N, Cin, H, W = x_nchw.shape
    Cout = w_oi.shape[0]
    P = N * H * W
    P_pad = ((P + 255) // 256) * 256            # clean (8,128)-friendly pixel count

    # Pixels-major staging, zero-padded along pixels.
    x_pm = jnp.transpose(x_nchw, (0, 2, 3, 1)).reshape(P, Cin)
    x_pm = jnp.pad(x_pm, ((0, P_pad - P), (0, 0)))
    gamma2 = gamma.reshape(1, Cin)
    beta2 = beta.reshape(1, Cin)
    w_io = jnp.transpose(w_oi.reshape(Cout, Cin), (1, 0))   # (Cin, Cout)

    assert Cout % cout_tiles == 0
    Ct = Cout // cout_tiles

    kernel = functools.partial(_bn_relu_conv1x1_kernel, inv_count=1.0 / float(P))

    out_pm = pl.pallas_call(
        kernel,
        out_shape=jax.ShapeDtypeStruct((P_pad, Cout), jnp.float32),
        grid=(cout_tiles,),
        in_specs=[
            pl.BlockSpec((P_pad, Cin), lambda j: (0, 0)),   # x: same block every step
            pl.BlockSpec((1, Cin), lambda j: (0, 0)),       # gamma (lane-dense row)
            pl.BlockSpec((1, Cin), lambda j: (0, 0)),       # beta  (lane-dense row)
            pl.BlockSpec((Cin, Ct), lambda j: (0, j)),      # weight Cout tile
        ],
        out_specs=pl.BlockSpec((P_pad, Ct), lambda j: (0, j)),
        compiler_params=pltpu.CompilerParams(
            dimension_semantics=("parallel",)),             # v7x: split Cout across TCs
    )(x_pm, gamma2, beta2, w_io)

    out = out_pm[:P].reshape(N, H, W, Cout)
    return jnp.transpose(out, (0, 3, 1, 2))


def reference(x_nchw, w_oi, gamma, beta):
    mean = jnp.mean(x_nchw, axis=(0, 2, 3), keepdims=True)
    var = jnp.mean((x_nchw - mean) ** 2, axis=(0, 2, 3), keepdims=True)
    xn = (x_nchw - mean) * jax.lax.rsqrt(var + EPS)
    xn = xn * gamma.reshape(1, -1, 1, 1) + beta.reshape(1, -1, 1, 1)
    xr = jnp.maximum(xn, 0.0)
    return jnp.einsum("oc,nchw->nohw", w_oi, xr)


if __name__ == "__main__":
    key = jax.random.PRNGKey(0)
    kx, kw, kg, kb = jax.random.split(key, 4)

    # Shapes from the PyTorch module: x (1, 256, 14, 14), Conv2d(256 -> 1024, 1x1, no bias)
    N, Cin, H, W = 1, 256, 14, 14
    Cout = 1024

    x = jax.random.normal(kx, (N, Cin, H, W), dtype=jnp.float32)
    w = jax.random.normal(kw, (Cout, Cin), dtype=jnp.float32) * 0.05
    gamma = 1.0 + 0.1 * jax.random.normal(kg, (Cin,), dtype=jnp.float32)
    beta = 0.1 * jax.random.normal(kb, (Cin,), dtype=jnp.float32)

    out = bn_relu_conv1x1(x, w, gamma, beta)
    out = jax.block_until_ready(out)

    ref = reference(x, w, gamma, beta)
    assert out.shape == (N, Cout, H, W), out.shape
    assert jnp.allclose(out, ref, atol=1e-3, rtol=1e-3), "mismatch vs reference"

    print("KERNEL_OK")
</pallas_src>

<mosaic_0001>
module attributes {stable_mosaic.version = 11 : i64} {
  func.func @_bn_relu_conv1x1_kernel(%arg0: i32, %arg1: memref<256x256xf32, #tpu.memory_space<vmem>>, %arg2: memref<1x256xf32, #tpu.memory_space<vmem>>, %arg3: memref<1x256xf32, #tpu.memory_space<vmem>>, %arg4: memref<256x256xf32, #tpu.memory_space<vmem>>, %arg5: memref<256x256xf32, #tpu.memory_space<vmem>>) attributes {dimension_semantics = [#tpu.dimension_semantics<parallel>], iteration_bounds = array<i64: 4>, scalar_prefetch = 0 : i64, scratch_operands = 0 : i64, tpu.core_type = #tpu.core_type<tc>, window_params = [{pipeline_mode = #tpu.pipeline_mode<synchronous>, transform_indices = @transform_0, window_bounds = array<i64: 256, 256>}, {pipeline_mode = #tpu.pipeline_mode<synchronous>, transform_indices = @transform_1, window_bounds = array<i64: 1, 256>}, {pipeline_mode = #tpu.pipeline_mode<synchronous>, transform_indices = @transform_2, window_bounds = array<i64: 1, 256>}, {transform_indices = @transform_3, window_bounds = array<i64: 256, 256>}, {transform_indices = @transform_4, window_bounds = array<i64: 256, 256>}]} {
    %c0 = arith.constant 0 : index
    %c0_0 = arith.constant 0 : index
    %0 = vector.load %arg1[%c0, %c0_0] : memref<256x256xf32, #tpu.memory_space<vmem>>, vector<256x256xf32>
    %cst = arith.constant dense<0.000000e+00> : vector<256xf32>
    %1 = vector.multi_reduction <add>, %0, %cst [0] : vector<256x256xf32> to vector<256xf32>
    %2 = vector.shape_cast %1 : vector<256xf32> to vector<1x256xf32>
    %3 = arith.mulf %0, %0 : vector<256x256xf32>
    %cst_1 = arith.constant dense<0.000000e+00> : vector<256xf32>
    %4 = vector.multi_reduction <add>, %3, %cst_1 [0] : vector<256x256xf32> to vector<256xf32>
    %5 = vector.shape_cast %4 : vector<256xf32> to vector<1x256xf32>
    %cst_2 = arith.constant 0.00510204071 : f32
    %6 = vector.broadcast %cst_2 : f32 to vector<1x256xf32>
    %7 = arith.mulf %2, %6 : vector<1x256xf32>
    %cst_3 = arith.constant 0.00510204071 : f32
    %8 = vector.broadcast %cst_3 : f32 to vector<1x256xf32>
    %9 = arith.mulf %5, %8 : vector<1x256xf32>
    %10 = arith.mulf %7, %7 : vector<1x256xf32>
    %11 = arith.subf %9, %10 : vector<1x256xf32>
    %cst_4 = arith.constant 9.99999974E-6 : f32
    %12 = vector.broadcast %cst_4 : f32 to vector<1x256xf32>
    %13 = arith.addf %11, %12 : vector<1x256xf32>
    %14 = math.rsqrt %13 : vector<1x256xf32>
    %c0_5 = arith.constant 0 : index
    %c0_6 = arith.constant 0 : index
    %15 = vector.load %arg2[%c0_5, %c0_6] : memref<1x256xf32, #tpu.memory_space<vmem>>, vector<1x256xf32>
    %16 = arith.mulf %14, %15 : vector<1x256xf32>
    %c0_7 = arith.constant 0 : index
    %c0_8 = arith.constant 0 : index
    %17 = vector.load %arg3[%c0_7, %c0_8] : memref<1x256xf32, #tpu.memory_space<vmem>>, vector<1x256xf32>
    %18 = arith.mulf %7, %16 : vector<1x256xf32>
    %19 = arith.subf %17, %18 : vector<1x256xf32>
    %20 = vector.broadcast %16 : vector<1x256xf32> to vector<256x256xf32>
    %21 = arith.mulf %0, %20 : vector<256x256xf32>
    %22 = vector.broadcast %19 : vector<1x256xf32> to vector<256x256xf32>
    %23 = arith.addf %21, %22 : vector<256x256xf32>
    %cst_9 = arith.constant 0.000000e+00 : f32
    %24 = vector.broadcast %cst_9 : f32 to vector<256x256xf32>
    %25 = arith.maximumf %23, %24 : vector<256x256xf32>
    %c0_10 = arith.constant 0 : index
    %c0_11 = arith.constant 0 : index
    %26 = vector.load %arg4[%c0_10, %c0_11] : memref<256x256xf32, #tpu.memory_space<vmem>>, vector<256x256xf32>
    %cst_12 = arith.constant dense<0.000000e+00> : vector<256x256xf32>
    %27 = tpu.matmul %25, %26, %cst_12 {dimension_numbers = #tpu.dot_dimension_numbers<[1], [0], [0], [1], [0, 0, 1, 1], [], []>} : vector<256x256xf32>, vector<256x256xf32>, vector<256x256xf32> -> vector<256x256xf32>
    %c0_13 = arith.constant 0 : index
    %c0_14 = arith.constant 0 : index
    %28 = vector.load %arg5[%c0_13, %c0_14] : memref<256x256xf32, #tpu.memory_space<vmem>>, vector<256x256xf32>
    tpu.vector_store %arg5[%c0_13, %c0_14], %27 {strides = array<i32>} : memref<256x256xf32, #tpu.memory_space<vmem>>, vector<256x256xf32>,
    return
  }
  func.func @transform_0(%arg0: i32) -> (i32, i32) {
    %c0_i32 = arith.constant 0 : i32
    %c0_i32_0 = arith.constant 0 : i32
    %c0_i32_1 = arith.constant 0 : i32
    return %c0_i32, %c0_i32_0 : i32, i32
  }
  func.func @transform_1(%arg0: i32) -> (i32, i32) {
    %c0_i32 = arith.constant 0 : i32
    %c0_i32_0 = arith.constant 0 : i32
    %c0_i32_1 = arith.constant 0 : i32
    return %c0_i32, %c0_i32_0 : i32, i32
  }
  func.func @transform_2(%arg0: i32) -> (i32, i32) {
    %c0_i32 = arith.constant 0 : i32
    %c0_i32_0 = arith.constant 0 : i32
    %c0_i32_1 = arith.constant 0 : i32
    return %c0_i32, %c0_i32_0 : i32, i32
  }
  func.func @transform_3(%arg0: i32) -> (i32, i32) {
    %c0_i32 = arith.constant 0 : i32
    %c0_i32_0 = arith.constant 0 : i32
    return %c0_i32, %arg0 : i32, i32
  }
  func.func @transform_4(%arg0: i32) -> (i32, i32) {
    %c0_i32 = arith.constant 0 : i32
    %c0_i32_0 = arith.constant 0 : i32
    return %c0_i32, %arg0 : i32, i32
  }
}

</mosaic_0001>

<bundles_post_ra>
// kernel: tpu_custom_call.1
= control target key start
LH: loop header
LB: loop body
LE: loop exit
PB: predicated region body
PF: predicated region fallthrough
CT: control target
= control target key end

     0   :  { %9 = vsyncpa [#allocation3], 0  ;;  %s2465_s0 = inlined_call_operand.hbm [shape: f32[256,256], index: 0, kind: input, shape index: {}]   ;;  %s2466_s1 = inlined_call_operand.vmem [shape: f32[1,256], index: 1, kind: input, shape index: {}]   ;;  %s2467_s2 = inlined_call_operand.vmem [shape: f32[1,256], index: 2, kind: input, shape index: {}]   ;;  %s2468_s3 = inlined_call_operand.hbm [shape: f32[256,1024], index: 3, kind: input, shape index: {}]   ;;  %s2469_s4 = inlined_call_operand.hbm [shape: f32[256,1024], index: 4, kind: output, shape index: {}]  }
   0x1   :  { %10 = vsyncpa [#allocation6], 0 }
   0x2   :  { %12 = vsyncpa [#allocation6 + $0x1], 0 }
   0x3   :  { %13 = vsyncpa [#allocation4], 0 }
   0x4   :  { %15 = vsyncpa [#allocation4 + $0x1], 0  ;;  %s1599_s15 = smov 0   ;;  %s1601_s16 = smov 0  }
   0x5   :  { %s1603_s17 = smov 0   ;;  %s1605_s18 = smov 0  }
   0x6 LB: > { %s1620_s19 = sadd.s32 4294967295, %s1562_s18   ;;  %s1252_s20 = sadd.s32 4294967294, %s1562_s18   ;;  %s1562_s18 = sphi %s1605_s18, %s2588_s18   ;;  %s1558_s17 = sphi %s1603_s17, %s2587_s17   ;;  %s1554_s16 = sphi %s1601_s16, %s2586_s16   ;;  %s1550_s15 = sphi %s1599_s15, %s2585_s15  }
   0x7   : > { %s1624_s21 = sadd.s32 1, %s1562_s18   ;;  %s91_s22 = sadd.s32 1, %s1558_s17 }
   0x8   : > { %s88_s23 = ssub.s32 %s1562_s18, %s1624_s21  ;;  %p98_p0 = scmp.ne.s32.totalorder %s1558_s17, %s1554_s16 }
   0x9   : > { %p89_p1 = scmp.eq.s32.totalorder %s88_s23, 0  ;;  %p99_p2 = scmp.eq.s32.totalorder %s1562_s18, 0 }
   0xa   : > { %p104_p3 = scmp.ne.s32.totalorder %s1554_s16, %s1550_s15  ;;  %p2470_p4 = scmp.eq.s32.totalorder %s1620_s19, 0 }
   0xb   : > { %s1636_s24 = scalar_select %p89_p1, %s1558_s17, %s91_s22  }
   0xc   : > { %p1638_p5 = por %p99_p2, %p98_p0  ;;  %p1644_p6 = por %p2470_p4, %p104_p3 }
   0xd   : > { %p128_p7 = scmp.eq.s32.totalorder %s1620_s19, 3  ;;  %p134_p8 = scmp.eq.s32.totalorder %s1252_s20, 3 }
   0xe   : > { %s2506_s25 = scalar_select %p1638_p5, 1, 0 }
   0xf   : > { %s2507_s26 = scalar_select %p1644_p6, 1, 0 }
  0x10   : > { %p1253_p9 = scmp.ge.s32.totalorder %s1562_s18, 1  ;;  %p141_p10 = scmp.lt.s32.totalorder %s1562_s18, 5 }
  0x11   : > { %p1651_p11 = por %p128_p7, %p98_p0  ;;  %p1655_p12 = por %p134_p8, %p104_p3 }
  0x12   : > { %p1659_p13 = pnand %p1253_p9, %p141_p10  ;;  %s1564_s30 = smov [#allocation2]  }
  0x13   : > { %s2508_s27 = scalar_select %p1651_p11, 1, 0 }
  0x14   : > { %s2509_s28 = scalar_select %p1655_p12, 1, 0 }
  0x15   : > { %s2510_s29 = scalar_select %p1659_p13, 1, 0 }
  0x16   : > { %p1374_p1 = pneg %p1659_p13  ;;  %s153_s5 = sshll.u32 %s1564_s30, 4  ;;  %s154_s5 = int_to_ptr.vmem [resolvable:$true] %s153_s5 }
  0x17   : > { %s173_s7 = sand.u32 1, %s1558_s17   ;;  %s1434_s10 = scalar_lea.hbm %s2465_s0, 8192 }
  0x18   : > { %p1667_p2 = pnand %p1374_p1, %p2470_p4  ;;  %p1435_p3 = scmp.ne.s32.totalorder %s2465_s0, %s1434_s10 }
  0x19   : > { %p1441_p10 = scmp.lt.u32.totalorder %s1434_s10, %s2465_s0 }
  0x1a   : > { %p1436_p7 = pneg %p1667_p2 }
  0x1c   : > { %p1437_p8 = pnand %p1436_p7, %p1435_p3 }
  0x1e   : > { %p1438_p9 = pneg %p1437_p8 }
  0x20   : > { %p1443_p1 = pnand %p1441_p10, %p1438_p9 }
  0x22   : > { %1446 = shalt.err (!%p1443_p1)
}
  0x23   : > { %s1447_s20 = scalar_lea.vmem %s154_s5, 8192  ;;  %p1455_p11 = scmp.lt.s32.totalorder %s154_s5, %s154_s5 }
  0x24   : > { %p1448_p4 = scmp.ne.s32.totalorder %s154_s5, %s1447_s20  ;;  %p1456_p6 = scmp.lt.s32.totalorder %s1447_s20, %s1447_s20 }
  0x26   : > { %p1450_p0 = pnand %p1448_p4, %p1436_p7  ;;  %p1457_p13 = por %p1456_p6, %p1455_p11 }
  0x28   : > { %p1451_p12 = pneg %p1450_p0 }
  0x2a   : > { %p1458_p5 = pnand %p1457_p13, %p1451_p12 }
  0x2c   : > { %1461 = shalt.err (!%p1458_p5)
}
  0x2d   : > { %s1565_s22 = smov 256   ;;  %s1566_s23 = smov 16  }
  0x2e   : > { %1377 = dma.hbm_to_vmem [thread:$0]  (!%p1667_p2), %s2465_s0, 8192, %s154_s5, [#allocation3], %s1565_s22, %s1565_s22, %s1566_s23  }
  0x2f   : > { %p2512_p4 = scmp.ne.s32.totalorder %s2506_s25, 0  ;;  %p2513_p0 = scmp.lt.s32.totalorder %s1562_s18, 4 }
  0x30   : > { %s1256_s10 = sshll.u32 %s173_s7, 9  ;;  %s1268_s11 = sshll.u32 %s1562_s18, 8 }
  0x31   : > { %p1696_p3 = pnand %p2513_p0, %p2512_p4  ;;  %s1704_s6 = scalar_lea.hbm %s2468_s3, %s1268_s11 }
  0x32   : > { %s177_s5 = scalar_lea.vmem [#allocation5], %s1256_s10  ;;  %s1708_s14 = scalar_lea.sflag [#allocation6], %s173_s7 }
  0x33   : > { %s184_s25 = sshll.u32 %s177_s5, 4  ;;  %s1462_s20 = scalar_lea.hbm %s1704_s6, 8192  ;;  %s1706_s25 = int_to_ptr.vmem [resolvable:$true] %s184_s25 }
  0x34   : > { %p1463_p5 = scmp.ne.s32.totalorder %s1704_s6, %s1462_s20  ;;  %p1464_p6 = pneg %p1696_p3 }
  0x35   : > { %s1467_s11 = scalar_lea.hbm %s2468_s3, 32768  ;;  %p1468_p13 = scmp.lt.u32.totalorder %s1704_s6, %s2468_s3 }
  0x36   : > { %p1465_p11 = pnand %p1464_p6, %p1463_p5  ;;  %p1469_p2 = scmp.lt.u32.totalorder %s1467_s11, %s1462_s20 }
  0x37   : > { %p1471_p8 = scmp.lt.u32.totalorder %s1462_s20, %s1704_s6 }
  0x38   : > { %p1466_p12 = pneg %p1465_p11  ;;  %p1470_p7 = por %p1469_p2, %p1468_p13 }
  0x3a   : > { %p1472_p9 = por %p1471_p8, %p1470_p7 }
  0x3c   : > { %p1473_p10 = pnand %p1472_p9, %p1466_p12 }
  0x3e   : > { %1476 = shalt.err (!%p1473_p10)
}
  0x3f   : > { %s1477_s7 = scalar_lea.vmem %s1706_s25, 8192  ;;  %s1567_s10 = smov [#allocation5]  }
  0x40   : > { %p1478_p1 = scmp.ne.s32.totalorder %s1706_s25, %s1477_s7  ;;  %s1482_s5 = sshll.u32 %s1567_s10, 4  ;;  %s1483_s5 = int_to_ptr.vmem [resolvable:$false] %s1482_s5 }
  0x41   : > { %s1484_s30 = scalar_lea.vmem %s1483_s5, 16384  ;;  %p1485_p5 = scmp.lt.s32.totalorder %s1706_s25, %s1483_s5 }
  0x42   : > { %p1480_p4 = pnand %p1478_p1, %p1464_p6  ;;  %p1486_p11 = scmp.lt.s32.totalorder %s1484_s30, %s1477_s7 }
  0x44   : > { %p1481_p0 = pneg %p1480_p4  ;;  %p1487_p13 = por %p1486_p11, %p1485_p5 }
  0x46   : > { %p1488_p2 = pnand %p1487_p13, %p1481_p0 }
  0x48   : > { %1491 = shalt.err (!%p1488_p2)
}
  0x49   : > { %s1568_s20 = smov 1024   ;;  %p2515_p6 = scmp.ne.s32.totalorder %s2510_s29, 0 }
  0x4a   : > { %1381 = dma.hbm_to_vmem [thread:$0]  (!%p1696_p3), %s1704_s6, 8192, %s1706_s25, %s1708_s14, %s1568_s20, %s1565_s22, %s1566_s23  }
  0x4b   : > { %196 = sbr.rel (%p2515_p6) target bundleno = 535 (0x217), region = 36 }
  0x52   : > { %p2516_p12 = scmp.eq.s32.totalorder %s1620_s19, 0 }
  0x54   : > { %1537 = dma.done.wait (%p2516_p12), [#allocation3], 8192   ;;  %p2517_p7 = pmov %p2516_p12 }
  0x55   : > { %s1745_s8 = sand.u32 1, %s1554_s16   ;;  %p2518_p3 = scmp.ne.s32.totalorder %s2507_s26, 0 }
  0x56   : > { %1539 = vsyncadd (%p2517_p7), [#allocation3], 4294959104  ;;  %s1261_s9 = sshll.u32 %s1745_s8, 9  ;;  %s203_s11 = scalar_lea.sflag [#allocation6], %s1745_s8 }
  0x57   : > { %s1751_s22 = scalar_lea.vmem [#allocation5], %s1261_s9 }
  0x58   : > { %1541 = dma.done.wait (%p2518_p3), %s203_s11, 8192  }
  0x59   : > { %1543 = vsyncadd (%p2518_p3), %s203_s11, 4294959104  ;;  %v769_v0 = vld [vmem:[%s1751_s22 + $0x8] sm:$0xff]  ;;  %v771_v1 = vld [vmem:[%s1751_s22 + $0x18] sm:$0xff]  ;;  %s2349_s25 = scalar_lea.vmem [#allocation7], %s1261_s9  ;;  %s1269_s14 = sshll.u32 %s1620_s19, 8 }
  0x5a   : > { %v768_v2 = vld [vmem:[%s1751_s22] sm:$0xff]  ;;  %v1270_v3 = vpack.c.bf16 %v771_v1, %v769_v0  ;;  %v770_v4 = vld [vmem:[%s1751_s22 + $0x10] sm:$0xff]  ;;  %v773_v5 = vld [vmem:[%s1751_s22 + $0x28] sm:$0xff]  ;;  %s1167_s12 = sshll.u32 %s2349_s25, 4  ;;  %s2416_s10 = scalar_lea.hbm %s2469_s4, %s1269_s14  ;;  %s2418_s12 = int_to_ptr.vmem [resolvable:$true] %s1167_s12 }
  0x5b   : > { %v775_v6 = vld [vmem:[%s1751_s22 + $0x38] sm:$0xff]  ;;  %v1272_v7 = vpack.c.bf16 %v770_v4, %v768_v2  ;;  %v772_v9 = vld [vmem:[%s1751_s22 + $0x20] sm:$0xff]  ;;  %v774_v10 = vld [vmem:[%s1751_s22 + $0x30] sm:$0xff]  ;;  %s1154_s19 = scalar_lea.sflag [#allocation4], %s1745_s8  ;;  %s1492_s5 = scalar_lea.vmem %s2418_s12, 8192 }
  0x5c   : > { %v1274_v8 = vpack.c.bf16 %v775_v6, %v773_v5  ;;  %v777_v11 = vld [vmem:[%s1751_s22 + $0x48] sm:$0xff]  ;;  %1271 = vmatprep.subr.bf16.mxu0 %v1270_v3  ;;  %1334 = vmatprep.subr.bf16.mxu1 %v1270_v3  ;;  %v779_v12 = vld [vmem:[%s1751_s22 + $0x58] sm:$0xff]  ;;  %v1276_v13 = vpack.c.bf16 %v774_v10, %v772_v9  ;;  %v776_v15 = vld [vmem:[%s1751_s22 + $0x40] sm:$0xff]  ;;  %p1493_p8 = scmp.ne.s32.totalorder %s2418_s12, %s1492_s5  ;;  %p2583_p9 = scmp.ne.s32.totalorder %s2508_s27, 0 }
  0x5d   : > { %1273 = vmatpush1.bf16.msra.mxu0 %v1272_v7  ;;  %1350 = vmatpush1.bf16.msra.mxu1 %v1272_v7  ;;  %v1278_v14 = vpack.c.bf16 %v779_v12, %v777_v11  ;;  %v778_v16 = vld [vmem:[%s1751_s22 + $0x50] sm:$0xff]  ;;  %v781_v17 = vld [vmem:[%s1751_s22 + $0x68] sm:$0xff]  ;;  %v783_v18 = vld [vmem:[%s1751_s22 + $0x78] sm:$0xff]  ;;  %s1570_s30 = smov [#allocation7]  }
  0x5e   : > { %1275 = vmatprep.subr.bf16.mxu0 %v1274_v8  ;;  %1335 = vmatprep.subr.bf16.mxu1 %v1274_v8  ;;  %v1280_v19 = vpack.c.bf16 %v778_v16, %v776_v15  ;;  %v1282_v20 = vpack.c.bf16 %v783_v18, %v781_v17  ;;  %v780_v21 = vld [vmem:[%s1751_s22 + $0x60] sm:$0xff]  ;;  %v782_v22 = vld [vmem:[%s1751_s22 + $0x70] sm:$0xff]  ;;  %v785_v23 = vld [vmem:[%s1751_s22 + $0x88] sm:$0xff]  ;;  %p1494_p10 = pnand %p1493_p8, %p2583_p9  ;;  %s1496_s20 = sshll.u32 %s1570_s30, 4  ;;  %s1497_s20 = int_to_ptr.vmem [resolvable:$false] %s1496_s20 }
  0x5f   : > { %v787_v24 = vld [vmem:[%s1751_s22 + $0x98] sm:$0xff]  ;;  %v1284_v25 = vpack.c.bf16 %v782_v22, %v780_v21  ;;  %v784_v27 = vld [vmem:[%s1751_s22 + $0x80] sm:$0xff]  ;;  %v786_v28 = vld [vmem:[%s1751_s22 + $0x90] sm:$0xff]  ;;  %s1498_s9 = scalar_lea.vmem %s1497_s20, 16384  ;;  %p1499_p4 = scmp.lt.s32.totalorder %s2418_s12, %s1497_s20 }
  0x60   : > { %v1286_v26 = vpack.c.bf16 %v787_v24, %v785_v23  ;;  %v789_v29 = vld [vmem:[%s1751_s22 + $0xa8] sm:$0xff]  ;;  %v791_v30 = vld [vmem:[%s1751_s22 + $0xb8] sm:$0xff]  ;;  %v1288_v31 = vpack.c.bf16 %v786_v28, %v784_v27  ;;  %v788_v33 = vld [vmem:[%s1751_s22 + $0xa0] sm:$0xff]  ;;  %p1495_p1 = pneg %p1494_p10  ;;  %p1500_p0 = scmp.lt.s32.totalorder %s1498_s9, %s1492_s5 }
  0x61   : > { %1277 = vmatpush1.bf16.msra.mxu0 %v1276_v13  ;;  %1351 = vmatpush1.bf16.msra.mxu1 %v1276_v13  ;;  %v1290_v32 = vpack.c.bf16 %v791_v30, %v789_v29  ;;  %v790_v34 = vld [vmem:[%s1751_s22 + $0xb0] sm:$0xff]  ;;  %v793_v35 = vld [vmem:[%s1751_s22 + $0xc8] sm:$0xff]  ;;  %v795_v36 = vld [vmem:[%s1751_s22 + $0xd8] sm:$0xff] }
  0x62   : > { %1279 = vmatprep.subr.bf16.mxu0 %v1278_v14  ;;  %1336 = vmatprep.subr.bf16.mxu1 %v1278_v14  ;;  %v1292_v37 = vpack.c.bf16 %v790_v34, %v788_v33  ;;  %v792_v38 = vld [vmem:[%s1751_s22 + $0xc0] sm:$0xff]  ;;  %v794_v39 = vld [vmem:[%s1751_s22 + $0xd0] sm:$0xff]  ;;  %v797_v40 = vld [vmem:[%s1751_s22 + $0xe8] sm:$0xff]  ;;  %v1294_v41 = vpack.c.bf16 %v795_v36, %v793_v35  ;;  %p1501_p5 = por %p1500_p0, %p1499_p4 }
  0x63   : > { %v799_v42 = vld [vmem:[%s1751_s22 + $0xf8] sm:$0xff]  ;;  %v1787_v43 = vld [vmem:[#allocation2] sm:$0xff]  ;;  %v1789_v44 = vld [vmem:[#allocation2 + $0x8] sm:$0xff]  ;;  %v1296_v51 = vpack.c.bf16 %v794_v39, %v792_v38 }
  0x64   : > { %v1791_v45 = vld [vmem:[#allocation2 + $0x10] sm:$0xff]  ;;  %v1793_v46 = vld [vmem:[#allocation2 + $0x18] sm:$0xff]  ;;  %v1795_v47 = vld [vmem:[#allocation2 + $0x20] sm:$0xff]  ;;  %v1298_v54 = vpack.c.bf16 %v799_v42, %v797_v40  ;;  %p1502_p11 = pnand %p1501_p5, %p1495_p1 }
  0x65   : > { %1281 = vmatpush1.bf16.msra.mxu0 %v1280_v19  ;;  %1352 = vmatpush1.bf16.msra.mxu1 %v1280_v19  ;;  %v1797_v48 = vld [vmem:[#allocation2 + $0x28] sm:$0xff]  ;;  %v297_v49 = vadd.f32 %v1791_v45, %v1787_v43  ;;  %v334_v50 = vadd.f32 %v1793_v46, %v1789_v44  ;;  %v1803_v52 = vld [vmem:[#allocation2 + $0x30] sm:$0xff]  ;;  %v1805_v53 = vld [vmem:[#allocation2 + $0x38] sm:$0xff] }
  0x66   : > { %1283 = vmatprep.subr.bf16.mxu0 %v1282_v20  ;;  %1337 = vmatprep.subr.bf16.mxu1 %v1282_v20  ;;  %v796_v55 = vld [vmem:[%s1751_s22 + $0xe0] sm:$0xff]  ;;  %v798_v56 = vld [vmem:[%s1751_s22 + $0xf0] sm:$0xff]  ;;  %v801_v57 = vld [vmem:[%s1751_s22 + $0x108] sm:$0xff] }
  0x67   : > { %v298_v58 = vadd.f32 %v297_v49, %v1795_v47  ;;  %v335_v59 = vadd.f32 %v334_v50, %v1797_v48  ;;  %v803_v60 = vld [vmem:[%s1751_s22 + $0x118] sm:$0xff]  ;;  %v1813_v61 = vld [vmem:[#allocation2 + $0x40] sm:$0xff]  ;;  %v1815_v62 = vld [vmem:[#allocation2 + $0x48] sm:$0xff]  ;;  %v1300_v1 = vpack.c.bf16 %v798_v56, %v796_v55 }
  0x68   : > { %v1819_v2 = vld [vmem:[#allocation2 + $0x50] sm:$0xff]  ;;  %v1821_v3 = vld [vmem:[#allocation2 + $0x58] sm:$0xff]  ;;  %v1302_v4 = vpack.c.bf16 %v803_v60, %v801_v57  ;;  %v800_v5 = vld [vmem:[%s1751_s22 + $0x100] sm:$0xff] }
  0x69   : > { %1285 = vmatpush1.bf16.msra.mxu0 %v1284_v25  ;;  %1353 = vmatpush1.bf16.msra.mxu1 %v1284_v25  ;;  %v299_v63 = vadd.f32 %v298_v58, %v1803_v52  ;;  %v336_v0 = vadd.f32 %v335_v59, %v1805_v53  ;;  %v802_v6 = vld [vmem:[%s1751_s22 + $0x110] sm:$0xff]  ;;  %v805_v7 = vld [vmem:[%s1751_s22 + $0x128] sm:$0xff]  ;;  %v807_v10 = vld [vmem:[%s1751_s22 + $0x138] sm:$0xff] }
  0x6a   : > { %1287 = vmatprep.subr.bf16.mxu0 %v1286_v26  ;;  %1338 = vmatprep.subr.bf16.mxu1 %v1286_v26  ;;  %v1829_v11 = vld [vmem:[#allocation2 + $0x60] sm:$0xff]  ;;  %v1831_v12 = vld [vmem:[#allocation2 + $0x68] sm:$0xff]  ;;  %v1304_v15 = vpack.c.bf16 %v802_v6, %v800_v5  ;;  %v1835_v16 = vld [vmem:[#allocation2 + $0x70] sm:$0xff]  ;;  %v1306_v18 = vpack.c.bf16 %v807_v10, %v805_v7  ;;  %v371_v7 = vmul.f32 %v1787_v43, %v1787_v43 }
  0x6b   : > { %v300_v8 = vadd.f32 %v299_v63, %v1813_v61  ;;  %v337_v9 = vadd.f32 %v336_v0, %v1815_v62  ;;  %2519 = vst [vmem:[#allocation11_spill] sm:$0xff] %v1829_v11  ;;  %2520 = vst [vmem:[#allocation12_spill] sm:$0xff] %v1835_v16  ;;  %v1837_v17 = vld [vmem:[#allocation2 + $0x78] sm:$0xff]  ;;  %v804_v19 = vld [vmem:[%s1751_s22 + $0x120] sm:$0xff] }
  0x6c   : > { %2521 = vst [vmem:[#allocation13_spill] sm:$0xff] %v1837_v17  ;;  %v806_v20 = vld [vmem:[%s1751_s22 + $0x130] sm:$0xff]  ;;  %v809_v21 = vld [vmem:[%s1751_s22 + $0x148] sm:$0xff]  ;;  %v811_v24 = vld [vmem:[%s1751_s22 + $0x158] sm:$0xff] }
  0x6d   : > { %1289 = vmatpush1.bf16.msra.mxu0 %v1288_v31  ;;  %1354 = vmatpush1.bf16.msra.mxu1 %v1288_v31  ;;  %v301_v13 = vadd.f32 %v300_v8, %v1819_v2  ;;  %v338_v14 = vadd.f32 %v337_v9, %v1821_v3  ;;  %v1845_v25 = vld [vmem:[#allocation2 + $0x80] sm:$0xff]  ;;  %v1847_v26 = vld [vmem:[#allocation2 + $0x88] sm:$0xff]  ;;  %v1308_v29 = vpack.c.bf16 %v806_v20, %v804_v19  ;;  %v1851_v30 = vld [vmem:[#allocation2 + $0x90] sm:$0xff] }
  0x6e   : > { %1291 = vmatprep.subr.bf16.mxu0 %v1290_v32  ;;  %1339 = vmatprep.subr.bf16.mxu1 %v1290_v32  ;;  %2522 = vst [vmem:[#allocation14_spill] sm:$0xff] %v1845_v25  ;;  %2523 = vst [vmem:[#allocation15_spill] sm:$0xff] %v1847_v26  ;;  %v1853_v31 = vld [vmem:[#allocation2 + $0x98] sm:$0xff]  ;;  %v1310_v32 = vpack.c.bf16 %v811_v24, %v809_v21  ;;  %v808_v33 = vld [vmem:[%s1751_s22 + $0x140] sm:$0xff] }
  0x6f   : > { %v302_v22 = vadd.f32 %v301_v13, %v1829_v11  ;;  %v339_v23 = vadd.f32 %v338_v14, %v1831_v12  ;;  %2524 = vst [vmem:[#allocation16_spill] sm:$0xff] %v1851_v30  ;;  %2525 = vst [vmem:[#allocation17_spill] sm:$0xff] %v1853_v31  ;;  %v810_v34 = vld [vmem:[%s1751_s22 + $0x150] sm:$0xff]  ;;  %v813_v35 = vld [vmem:[%s1751_s22 + $0x168] sm:$0xff]  ;;  %v372_v13 = vmul.f32 %v1789_v44, %v1789_v44 }
  0x70   : > { %v815_v38 = vld [vmem:[%s1751_s22 + $0x178] sm:$0xff]  ;;  %v1861_v39 = vld [vmem:[#allocation2 + $0xa0] sm:$0xff]  ;;  %v1863_v40 = vld [vmem:[#allocation2 + $0xa8] sm:$0xff]  ;;  %v1312_v50 = vpack.c.bf16 %v810_v34, %v808_v33  ;;  %v373_v14 = vmul.f32 %v1791_v45, %v1791_v45 }
  0x71   : > { %1293 = vmatpush1.bf16.msra.mxu0 %v1292_v37  ;;  %1355 = vmatpush1.bf16.msra.mxu1 %v1292_v37  ;;  %v303_v27 = vadd.f32 %v302_v22, %v1835_v16  ;;  %v340_v28 = vadd.f32 %v339_v23, %v1837_v17  ;;  %2526 = vst [vmem:[#allocation18_spill] sm:$0xff] %v1861_v39  ;;  %2527 = vst [vmem:[#allocation19_spill] sm:$0xff] %v1863_v40  ;;  %v1871_v55 = vld [vmem:[#allocation2 + $0xb8] sm:$0xff]  ;;  %v817_v57 = vld [vmem:[%s1751_s22 + $0x188] sm:$0xff] }
  0x72   : > { %1295 = vmatprep.subr.bf16.mxu0 %v1294_v41  ;;  %1340 = vmatprep.subr.bf16.mxu1 %v1294_v41  ;;  %v812_v41 = vld [vmem:[%s1751_s22 + $0x160] sm:$0xff]  ;;  %2529 = vst [vmem:[#allocation21_spill] sm:$0xff] %v1871_v55  ;;  %v1314_v56 = vpack.c.bf16 %v815_v38, %v813_v35  ;;  %v819_v60 = vld [vmem:[%s1751_s22 + $0x198] sm:$0xff]  ;;  %v1879_v0 = vld [vmem:[#allocation2 + $0xc8] sm:$0xff]  ;;  %v377_v35 = vmul.f32 %v1803_v52, %v1803_v52 }
  0x73   : > { %v304_v36 = vadd.f32 %v303_v27, %v1845_v25  ;;  %v341_v37 = vadd.f32 %v340_v28, %v1847_v26  ;;  %v1877_v63 = vld [vmem:[#allocation2 + $0xc0] sm:$0xff]  ;;  %2531 = vst [vmem:[#allocation23_spill] sm:$0xff] %v1879_v0  ;;  %v818_v8 = vld [vmem:[%s1751_s22 + $0x190] sm:$0xff]  ;;  %v1889_v10 = vld [vmem:[#allocation2 + $0xd8] sm:$0xff]  ;;  %v375_v27 = vmul.f32 %v1795_v47, %v1795_v47  ;;  %v376_v28 = vmul.f32 %v1797_v48, %v1797_v48 }
  0x74   : > { %2530 = vst [vmem:[#allocation22_spill] sm:$0xff] %v1877_v63  ;;  %v1887_v9 = vld [vmem:[#allocation2 + $0xd0] sm:$0xff]  ;;  %2533 = vst [vmem:[#allocation25_spill] sm:$0xff] %v1889_v10  ;;  %v821_v19 = vld [vmem:[%s1751_s22 + $0x1a8] sm:$0xff] }
  0x75   : > { %1297 = vmatpush1.bf16.msra.mxu0 %v1296_v51  ;;  %1356 = vmatpush1.bf16.msra.mxu1 %v1296_v51  ;;  %v305_v42 = vadd.f32 %v304_v36, %v1851_v30  ;;  %v342_v49 = vadd.f32 %v341_v37, %v1853_v31  ;;  %v814_v51 = vld [vmem:[%s1751_s22 + $0x170] sm:$0xff]  ;;  %2532 = vst [vmem:[#allocation24_spill] sm:$0xff] %v1887_v9  ;;  %v823_v22 = vld [vmem:[%s1751_s22 + $0x1b8] sm:$0xff]  ;;  %v1901_v23 = vld [vmem:[#allocation2 + $0xe0] sm:$0xff] }
  0x76   : > { %1299 = vmatprep.subr.bf16.mxu0 %v1298_v54  ;;  %1341 = vmatprep.subr.bf16.mxu1 %v1298_v54  ;;  %v1869_v54 = vld [vmem:[#allocation2 + $0xb0] sm:$0xff]  ;;  %2534 = vst [vmem:[#allocation26_spill] sm:$0xff] %v1901_v23  ;;  %v1903_v24 = vld [vmem:[#allocation2 + $0xe8] sm:$0xff]  ;;  %v1917_v38 = vld [vmem:[#allocation2 + $0xf8] sm:$0xff] }
  0x77   : > { %2528 = vst [vmem:[#allocation20_spill] sm:$0xff] %v1869_v54  ;;  %v306_v58 = vadd.f32 %v305_v42, %v1861_v39  ;;  %v343_v59 = vadd.f32 %v342_v49, %v1863_v40  ;;  %2535 = vst [vmem:[#allocation27_spill] sm:$0xff] %v1903_v24  ;;  %v822_v36 = vld [vmem:[%s1751_s22 + $0x1b0] sm:$0xff]  ;;  %v435_v42 = vadd.f32 %v373_v14, %v371_v7 }
  0x78   : > { %v1915_v37 = vld [vmem:[#allocation2 + $0xf0] sm:$0xff]  ;;  %2537 = vst [vmem:[#allocation29_spill] sm:$0xff] %v1917_v38 }
  0x79   : > { %1301 = vmatpush1.bf16.msra.mxu0 %v1300_v1  ;;  %1357 = vmatpush1.bf16.msra.mxu1 %v1300_v1  ;;  %v1316_v1 = vpack.c.bf16 %v814_v51, %v812_v41  ;;  %v307_v5 = vadd.f32 %v306_v58, %v1869_v54  ;;  %v344_v6 = vadd.f32 %v343_v59, %v1871_v55  ;;  %v825_v51 = vld [vmem:[%s1751_s22 + $0x1c8] sm:$0xff]  ;;  %v827_v58 = vld [vmem:[%s1751_s22 + $0x1d8] sm:$0xff]  ;;  %v1925_v59 = vld [vmem:[#allocation2 + $0x100] sm:$0xff] }
  0x7a   : > { %1303 = vmatprep.subr.bf16.mxu0 %v1302_v4  ;;  %1342 = vmatprep.subr.bf16.mxu1 %v1302_v4  ;;  %v816_v4 = vld [vmem:[%s1751_s22 + $0x180] sm:$0xff]  ;;  %2536 = vst [vmem:[#allocation28_spill] sm:$0xff] %v1915_v37  ;;  %v378_v41 = vmul.f32 %v1805_v53, %v1805_v53 }
  0x7b   : > { %v308_v20 = vadd.f32 %v307_v5, %v1877_v63  ;;  %v345_v21 = vadd.f32 %v344_v6, %v1879_v0  ;;  %v436_v5 = vadd.f32 %v435_v42, %v375_v27  ;;  %v1951_v42 = vld [vmem:[#allocation2 + $0x128] sm:$0xff] }
  0x7d   : > { %1305 = vmatpush1.bf16.msra.mxu0 %v1304_v15  ;;  %1358 = vmatpush1.bf16.msra.mxu1 %v1304_v15  ;;  %v374_v15 = vmul.f32 %v1793_v46, %v1793_v46  ;;  %v309_v33 = vadd.f32 %v308_v20, %v1887_v9  ;;  %v346_v34 = vadd.f32 %v345_v21, %v1889_v10  ;;  %v1941_v20 = vld [vmem:[#allocation2 + $0x118] sm:$0xff] }
  0x7e   : > { %1307 = vmatprep.subr.bf16.mxu0 %v1306_v18  ;;  %1343 = vmatprep.subr.bf16.mxu1 %v1306_v18  ;;  %v1318_v18 = vpack.c.bf16 %v819_v60, %v817_v57  ;;  %v1927_v60 = vld [vmem:[#allocation2 + $0x108] sm:$0xff]  ;;  %v382_v21 = vmul.f32 %v1821_v3, %v1821_v3 }
  0x7f   : > { %v472_v49 = vadd.f32 %v374_v15, %v372_v13  ;;  %v347_v57 = vadd.f32 %v346_v34, %v1903_v24  ;;  %v381_v15 = vmul.f32 %v1819_v2, %v1819_v2  ;;  %v831_v34 = vld [vmem:[%s1751_s22 + $0x1f8] sm:$0xff] }
  0x81   : > { %1309 = vmatpush1.bf16.msra.mxu0 %v1308_v29  ;;  %1359 = vmatpush1.bf16.msra.mxu1 %v1308_v29  ;;  %v1320_v29 = vpack.c.bf16 %v818_v8, %v816_v4  ;;  %v380_v4 = vmul.f32 %v1815_v62, %v1815_v62  ;;  %v473_v6 = vadd.f32 %v472_v49, %v376_v28  ;;  %v824_v8 = vld [vmem:[%s1751_s22 + $0x1c0] sm:$0xff] }
  0x82   : > { %1311 = vmatprep.subr.bf16.mxu0 %v1310_v32  ;;  %1344 = vmatprep.subr.bf16.mxu1 %v1310_v32  ;;  %v820_v32 = vld [vmem:[%s1751_s22 + $0x1a0] sm:$0xff]  ;;  %v348_v14 = vadd.f32 %v347_v57, %v1917_v38  ;;  %v1326_v28 = vpack.c.bf16 %v827_v58, %v825_v51  ;;  %v383_v49 = vmul.f32 %v1829_v11, %v1829_v11 }
  0x83   : > { %v1324_v7 = vpack.c.bf16 %v822_v36, %v820_v32  ;;  %v474_v27 = vadd.f32 %v473_v6, %v378_v41  ;;  %v829_v32 = vld [vmem:[%s1751_s22 + $0x1e8] sm:$0xff]  ;;  %v1949_v36 = vld [vmem:[#allocation2 + $0x120] sm:$0xff]  ;;  %v830_v6 = vld [vmem:[%s1751_s22 + $0x1f0] sm:$0xff] }
  0x85   : > { %1313 = vmatpush1.bf16.msra.mxu0 %v1312_v50  ;;  %1360 = vmatpush1.bf16.msra.mxu1 %v1312_v50  ;;  %v1322_v50 = vpack.c.bf16 %v823_v22, %v821_v19  ;;  %v1939_v19 = vld [vmem:[#allocation2 + $0x110] sm:$0xff]  ;;  %v437_v22 = vadd.f32 %v436_v5, %v377_v35  ;;  %v384_v35 = vmul.f32 %v1831_v12, %v1831_v12 }
  0x86   : > { %1315 = vmatprep.subr.bf16.mxu0 %v1314_v56  ;;  %1345 = vmatprep.subr.bf16.mxu1 %v1314_v56  ;;  %v310_v56 = vadd.f32 %v309_v33, %v1901_v23  ;;  %v385_v5 = vmul.f32 %v1835_v16, %v1835_v16  ;;  %v388_v16 = vmul.f32 %v1847_v26, %v1847_v26  ;;  %v2097_v26 = vld [vmem:[#allocation2 + $0x1f8] sm:$0xff] }
  0x87   : > { %2550 = vst [vmem:[#allocation42_spill] sm:$0xff] %v2097_v26 }
  0x88   : > { %v311_v13 = vadd.f32 %v310_v56, %v1915_v37  ;;  %v828_v56 = vld [vmem:[%s1751_s22 + $0x1e0] sm:$0xff] }
  0x89   : > { %1317 = vmatpush1.bf16.msra.mxu0 %v1316_v1  ;;  %1361 = vmatpush1.bf16.msra.mxu1 %v1316_v1  ;;  %v379_v1 = vmul.f32 %v1813_v61, %v1813_v61 }
  0x8a   : > { %1319 = vmatprep.subr.bf16.mxu0 %v1318_v18  ;;  %1346 = vmatprep.subr.bf16.mxu1 %v1318_v18  ;;  %v826_v18 = vld [vmem:[%s1751_s22 + $0x1d0] sm:$0xff]  ;;  %v312_v33 = vadd.f32 %v311_v13, %v1925_v59 }
  0x8b   : > { %v438_v41 = vadd.f32 %v437_v22, %v379_v1  ;;  %v1328_v51 = vpack.c.bf16 %v826_v18, %v824_v8  ;;  %v1963_v13 = vld [vmem:[#allocation2 + $0x130] sm:$0xff]  ;;  %v386_v1 = vmul.f32 %v1837_v17, %v1837_v17  ;;  %v1330_v18 = vpack.c.bf16 %v831_v34, %v829_v32 }
  0x8c   : > { %v313_v57 = vadd.f32 %v312_v33, %v1939_v19  ;;  %v1971_v33 = vld [vmem:[#allocation2 + $0x140] sm:$0xff]  ;;  %v389_v34 = vmul.f32 %v1851_v30, %v1851_v30 }
  0x8d   : > { %1321 = vmatpush1.bf16.msra.mxu0 %v1320_v29  ;;  %1362 = vmatpush1.bf16.msra.mxu1 %v1320_v29  ;;  %v349_v29 = vadd.f32 %v348_v14, %v1927_v60  ;;  %v1965_v14 = vld [vmem:[#allocation2 + $0x138] sm:$0xff] }
  0x8e   : > { %1323 = vmatprep.subr.bf16.mxu0 %v1322_v50  ;;  %1347 = vmatprep.subr.bf16.mxu1 %v1322_v50  ;;  %v475_v50 = vadd.f32 %v474_v27, %v380_v4  ;;  %v439_v4 = vadd.f32 %v438_v41, %v381_v15  ;;  %v314_v22 = vadd.f32 %v313_v57, %v1949_v36  ;;  %v1983_v41 = vld [vmem:[#allocation2 + $0x150] sm:$0xff] }
  0x8f   : > { %v350_v58 = vadd.f32 %v349_v29, %v1941_v20  ;;  %v387_v29 = vmul.f32 %v1845_v25, %v1845_v25  ;;  %v390_v57 = vmul.f32 %v1853_v31, %v1853_v31  ;;  %v2083_v31 = vld [vmem:[#allocation2 + $0x1e8] sm:$0xff]  ;;  %v413_v25 = vmul.f32 %v1983_v41, %v1983_v41 }
  0x90   : > { %v476_v8 = vadd.f32 %v475_v50, %v382_v21  ;;  %v440_v17 = vadd.f32 %v439_v4, %v383_v49  ;;  %v1332_v21 = vpack.c.bf16 %v830_v6, %v828_v56  ;;  %v1985_v50 = vld [vmem:[#allocation2 + $0x158] sm:$0xff]  ;;  %v1991_v6 = vld [vmem:[#allocation2 + $0x160] sm:$0xff]  ;;  %v1993_v4 = vld [vmem:[#allocation2 + $0x168] sm:$0xff]  ;;  %2548 = vst [vmem:[#allocation40_spill] sm:$0xff] %v2083_v31 }
  0x91   : > { %1325 = vmatpush1.bf16.msra.mxu0 %v1324_v7  ;;  %1363 = vmatpush1.bf16.msra.mxu1 %v1324_v7  ;;  %v351_v27 = vadd.f32 %v350_v58, %v1951_v42  ;;  %v1973_v7 = vld [vmem:[#allocation2 + $0x148] sm:$0xff]  ;;  %2538 = vst [vmem:[#allocation30_spill] sm:$0xff] %v1991_v6 }
  0x92   : > { %1327 = vmatprep.subr.bf16.mxu0 %v1326_v28  ;;  %1348 = vmatprep.subr.bf16.mxu1 %v1326_v28  ;;  %v477_v15 = vadd.f32 %v476_v8, %v384_v35  ;;  %v315_v28 = vadd.f32 %v314_v22, %v1963_v13  ;;  %v441_v58 = vadd.f32 %v440_v17, %v385_v5 }
  0x93   : > { %v352_v32 = vadd.f32 %v351_v27, %v1965_v14  ;;  %v392_v8 = vmul.f32 %v1863_v40, %v1863_v40  ;;  %v2067_v40 = vld [vmem:[#allocation2 + $0x1d8] sm:$0xff] }
  0x94   : > { %v478_v49 = vadd.f32 %v477_v15, %v386_v1  ;;  %v316_v35 = vadd.f32 %v315_v28, %v1971_v33  ;;  %v442_v22 = vadd.f32 %v441_v58, %v387_v29  ;;  %v393_v1 = vmul.f32 %v1869_v54, %v1869_v54  ;;  %v2005_v15 = vld [vmem:[#allocation2 + $0x178] sm:$0xff]  ;;  %v2011_v58 = vld [vmem:[#allocation2 + $0x180] sm:$0xff]  ;;  %2546 = vst [vmem:[#allocation38_spill] sm:$0xff] %v2067_v40 }
  0x95   : > { %1329 = vmatpush1.bf16.msra.mxu0 %v1328_v51  ;;  %1364 = vmatpush1.bf16.msra.mxu1 %v1328_v51  ;;  %v353_v56 = vadd.f32 %v352_v32, %v1973_v7  ;;  %v391_v51 = vmul.f32 %v1861_v39, %v1861_v39  ;;  %2540 = vst [vmem:[#allocation32_spill] sm:$0xff] %v2005_v15 }
  0x96   : > { %1331 = vmatprep.subr.bf16.mxu0 %v1330_v18  ;;  %1349 = vmatprep.subr.bf16.mxu1 %v1330_v18  ;;  %v479_v27 = vadd.f32 %v478_v49, %v388_v16  ;;  %v317_v17 = vadd.f32 %v316_v35, %v1983_v41  ;;  %v2003_v18 = vld [vmem:[#allocation2 + $0x170] sm:$0xff]  ;;  %v394_v28 = vmul.f32 %v1871_v55, %v1871_v55  ;;  %v2013_v49 = vld [vmem:[#allocation2 + $0x188] sm:$0xff] }
  0x97   : > { %v354_v5 = vadd.f32 %v353_v56, %v1985_v50  ;;  %2539 = vst [vmem:[#allocation31_spill] sm:$0xff] %v2003_v18  ;;  %v443_v32 = vadd.f32 %v442_v22, %v389_v34  ;;  %v396_v35 = vmul.f32 %v1879_v0, %v1879_v0  ;;  %v2023_v22 = vld [vmem:[#allocation2 + $0x198] sm:$0xff]  ;;  %v417_v11 = vmul.f32 %v2003_v18, %v2003_v18 }
  0x98   : > { %v480_v39 = vadd.f32 %v479_v27, %v390_v57  ;;  %v318_v16 = vadd.f32 %v317_v17, %v1991_v6  ;;  %v2021_v57 = vld [vmem:[#allocation2 + $0x190] sm:$0xff]  ;;  %2542 = vst [vmem:[#allocation34_spill] sm:$0xff] %v2023_v22  ;;  %v397_v27 = vmul.f32 %v1887_v9, %v1887_v9  ;;  %v398_v17 = vmul.f32 %v1889_v10, %v1889_v10 }
  0x99   : > { %1333 = vmatpush1.bf16.msra.mxu0 %v1332_v21  ;;  %1365 = vmatpush1.bf16.msra.mxu1 %v1332_v21  ;;  %v355_v29 = vadd.f32 %v354_v5, %v1993_v4  ;;  %v395_v21 = vmul.f32 %v1877_v63, %v1877_v63  ;;  %v444_v56 = vadd.f32 %v443_v32, %v391_v51  ;;  %v2031_v51 = vld [vmem:[#allocation2 + $0x1a0] sm:$0xff] }
  0x9a   : > { %v481_v54 = vadd.f32 %v480_v39, %v392_v8  ;;  %v319_v55 = vadd.f32 %v318_v16, %v2003_v18  ;;  %2541 = vst [vmem:[#allocation33_spill] sm:$0xff] %v2021_v57  ;;  %v2033_v8 = vld [vmem:[#allocation2 + $0x1a8] sm:$0xff]  ;;  %v399_v32 = vmul.f32 %v1901_v23, %v1901_v23  ;;  %v400_v16 = vmul.f32 %v1903_v24, %v1903_v24 }
  0x9b   : > { %v356_v34 = vadd.f32 %v355_v29, %v2005_v15  ;;  %v445_v5 = vadd.f32 %v444_v56, %v393_v1  ;;  %v2041_v1 = vld [vmem:[#allocation2 + $0x1b0] sm:$0xff]  ;;  %v402_v56 = vmul.f32 %v1917_v38, %v1917_v38 }
  0x9c   : > { %v482_v63 = vadd.f32 %v481_v54, %v394_v28  ;;  %v320_v0 = vadd.f32 %v319_v55, %v2011_v58  ;;  %v2043_v55 = vld [vmem:[#allocation2 + $0x1b8] sm:$0xff]  ;;  %v401_v28 = vmul.f32 %v1915_v37, %v1915_v37 }
  0x9d   : > { %v357_v39 = vadd.f32 %v356_v34, %v2013_v49  ;;  %v446_v29 = vadd.f32 %v445_v5, %v395_v21  ;;  %v2051_v21 = vld [vmem:[#allocation2 + $0x1c0] sm:$0xff]  ;;  %v404_v5 = vmul.f32 %v1927_v60, %v1927_v60 }
  0x9e   : > { %v483_v9 = vadd.f32 %v482_v63, %v396_v35  ;;  %v321_v10 = vadd.f32 %v320_v0, %v2021_v57  ;;  %2543 = vst [vmem:[#allocation35_spill] sm:$0xff] %v2051_v21  ;;  %v2053_v0 = vld [vmem:[#allocation2 + $0x1c8] sm:$0xff]  ;;  %v403_v35 = vmul.f32 %v1925_v59, %v1925_v59 }
  0x9f   : > { %v358_v54 = vadd.f32 %v357_v39, %v2023_v22  ;;  %v447_v34 = vadd.f32 %v446_v29, %v397_v27  ;;  %2544 = vst [vmem:[#allocation36_spill] sm:$0xff] %v2053_v0  ;;  %v406_v27 = vmul.f32 %v1941_v20, %v1941_v20 }
  0xa0   : > { %v484_v23 = vadd.f32 %v483_v9, %v398_v17  ;;  %v322_v24 = vadd.f32 %v321_v10, %v2031_v51  ;;  %v405_v10 = vmul.f32 %v1939_v19, %v1939_v19 }
  0xa1   : > { %v359_v63 = vadd.f32 %v358_v54, %v2033_v8  ;;  %v448_v39 = vadd.f32 %v447_v34, %v399_v32  ;;  %v2065_v54 = vld [vmem:[#allocation2 + $0x1d0] sm:$0xff]  ;;  %v408_v32 = vmul.f32 %v1951_v42, %v1951_v42 }
  0xa2   : > { %v485_v37 = vadd.f32 %v484_v23, %v400_v16  ;;  %v323_v38 = vadd.f32 %v322_v24, %v2041_v1  ;;  %2545 = vst [vmem:[#allocation37_spill] sm:$0xff] %v2065_v54  ;;  %v407_v24 = vmul.f32 %v1949_v36, %v1949_v36 }
  0xa3   : > { %v360_v9 = vadd.f32 %v359_v63, %v2043_v55  ;;  %v449_v17 = vadd.f32 %v448_v39, %v401_v28  ;;  %v409_v28 = vmul.f32 %v1963_v13, %v1963_v13 }
  0xa4   : > { %v486_v29 = vadd.f32 %v485_v37, %v402_v56  ;;  %v324_v30 = vadd.f32 %v323_v38, %v2051_v21  ;;  %v410_v37 = vmul.f32 %v1965_v14, %v1965_v14 }
  0xa5   : > { %v361_v23 = vadd.f32 %v360_v9, %v2053_v0  ;;  %v450_v16 = vadd.f32 %v449_v17, %v403_v35  ;;  %v2081_v9 = vld [vmem:[#allocation2 + $0x1e0] sm:$0xff]  ;;  %v411_v35 = vmul.f32 %v1971_v33, %v1971_v33 }
  0xa6   : > { %v487_v34 = vadd.f32 %v486_v29, %v404_v5  ;;  %v325_v56 = vadd.f32 %v324_v30, %v2065_v54  ;;  %2547 = vst [vmem:[#allocation39_spill] sm:$0xff] %v2081_v9  ;;  %v412_v5 = vmul.f32 %v1973_v7, %v1973_v7  ;;  %v414_v30 = vmul.f32 %v1985_v50, %v1985_v50 }
  0xa7   : > { %v362_v38 = vadd.f32 %v361_v23, %v2067_v40  ;;  %v451_v63 = vadd.f32 %v450_v16, %v405_v10 }
  0xa8   : > { %v488_v39 = vadd.f32 %v487_v34, %v406_v27  ;;  %v326_v10 = vadd.f32 %v325_v56, %v2081_v9  ;;  %v2095_v34 = vld [vmem:[#allocation2 + $0x1f0] sm:$0xff]  ;;  %v418_v56 = vmul.f32 %v2005_v15, %v2005_v15 }
  0xa9   : > { %v452_v17 = vadd.f32 %v451_v63, %v407_v24  ;;  %v363_v27 = vadd.f32 %v362_v38, %v2083_v31  ;;  %2549 = vst [vmem:[#allocation41_spill] sm:$0xff] %v2095_v34  ;;  %v415_v24 = vmul.f32 %v1991_v6, %v1991_v6  ;;  %v420_v6 = vmul.f32 %v2013_v49, %v2013_v49 }
  0xaa   : > { %v489_v29 = vadd.f32 %v488_v39, %v408_v32  ;;  %v416_v32 = vmul.f32 %v1993_v4, %v1993_v4 }
  0xab   : > { %v453_v23 = vadd.f32 %v452_v17, %v409_v28  ;;  %v327_v28 = vadd.f32 %v326_v10, %v2095_v34 }
  0xac   : > { %v490_v16 = vadd.f32 %v489_v29, %v410_v37  ;;  %v364_v37 = vadd.f32 %v363_v27, %v2097_v26  ;;  %v419_v29 = vmul.f32 %v2011_v58, %v2011_v58 }
  0xad   : > { %v454_v63 = vadd.f32 %v453_v23, %v411_v35  ;;  %v421_v23 = vmul.f32 %v2021_v57, %v2021_v57  ;;  %v328_v18 = vrot.slane %v327_v28, 4 }
  0xae   : > { %v491_v39 = vadd.f32 %v490_v16, %v412_v5  ;;  %v422_v16 = vmul.f32 %v2023_v22, %v2023_v22  ;;  %v365_v10 = vrot.slane %v364_v37, 4 }
  0xaf   : > { %v455_v38 = vadd.f32 %v454_v63, %v413_v25  ;;  %v423_v25 = vmul.f32 %v2031_v51, %v2031_v51 }
  0xb0   : > { %v492_v17 = vadd.f32 %v491_v39, %v414_v30  ;;  %v424_v30 = vmul.f32 %v2033_v8, %v2033_v8 }
  0xb1   : > { %v456_v35 = vadd.f32 %v455_v38, %v415_v24  ;;  %v425_v24 = vmul.f32 %v2041_v1, %v2041_v1  ;;  %v329_v38 = vadd.f32 %v328_v18, %v327_v28 }
  0xb2   : > { %v493_v5 = vadd.f32 %v492_v17, %v416_v32  ;;  %v426_v32 = vmul.f32 %v2043_v55, %v2043_v55  ;;  %v366_v17 = vadd.f32 %v365_v10, %v364_v37  ;;  %v431_v37 = vmul.f32 %v2081_v9, %v2081_v9 }
  0xb3   : > { %v457_v15 = vadd.f32 %v456_v35, %v417_v11  ;;  %v427_v11 = vmul.f32 %v2051_v21, %v2051_v21 }
  0xb4   : > { %v494_v27 = vadd.f32 %v493_v5, %v418_v56  ;;  %v428_v56 = vmul.f32 %v2053_v0, %v2053_v0 }
  0xb5   : > { %v458_v63 = vadd.f32 %v457_v15, %v419_v29  ;;  %v430_v15 = vmul.f32 %v2067_v40, %v2067_v40  ;;  %v330_v29 = vrot.slane %v329_v38, 2 }
  0xb6   : > { %v495_v39 = vadd.f32 %v494_v27, %v420_v6  ;;  %v429_v6 = vmul.f32 %v2065_v54, %v2065_v54  ;;  %v367_v27 = vrot.slane %v366_v17, 2 }
  0xb7   : > { %v459_v57 = vadd.f32 %v458_v63, %v421_v23  ;;  %v432_v23 = vmul.f32 %v2083_v31, %v2083_v31 }
  0xb8   : > { %v496_v22 = vadd.f32 %v495_v39, %v422_v16 }
  0xb9   : > { %v460_v35 = vadd.f32 %v459_v57, %v423_v25  ;;  %v433_v57 = vmul.f32 %v2095_v34, %v2095_v34  ;;  %v331_v25 = vadd.f32 %v330_v29, %v329_v38 }
  0xba   : > { %v497_v5 = vadd.f32 %v496_v22, %v424_v30  ;;  %v434_v22 = vmul.f32 %v2097_v26, %v2097_v26  ;;  %v368_v30 = vadd.f32 %v367_v27, %v366_v17 }
  0xbb   : > { %v461_v18 = vadd.f32 %v460_v35, %v425_v24  ;;  %v332_v35 = vrot.slane %v331_v25, 1 }
  0xbc   : > { %v498_v28 = vadd.f32 %v497_v5, %v426_v32  ;;  %v369_v5 = vrot.slane %v368_v30, 1 }
  0xbd   : > { %v462_v16 = vadd.f32 %v461_v18, %v427_v11  ;;  %v333_v11 = vadd.f32 %v332_v35, %v331_v25 }
  0xbe   : > { %v499_v10 = vadd.f32 %v498_v28, %v428_v56  ;;  %v370_v56 = vadd.f32 %v369_v5, %v368_v30 }
  0xbf   : > { %v463_v63 = vadd.f32 %v462_v16, %v429_v6  ;;  %v509_v38 = vmul.f32 0.0051020407, %v333_v11 }
  0xc0   : > { %v500_v39 = vadd.f32 %v499_v10, %v430_v15  ;;  %v510_v17 = vmul.f32 0.0051020407, %v370_v56 }
  0xc1   : > { %v464_v24 = vadd.f32 %v463_v63, %v431_v37  ;;  %v513_v37 = vmul.f32 %v509_v38, %v509_v38 }
  0xc2   : > { %v501_v32 = vadd.f32 %v500_v39, %v432_v23  ;;  %v514_v23 = vmul.f32 %v510_v17, %v510_v17 }
  0xc3   : > { %v465_v9 = vadd.f32 %v464_v24, %v433_v57  ;;  %v523_v57 = vlaneseq }
  0xc4   : > { %v502_v54 = vadd.f32 %v501_v32, %v434_v22 }
  0xc5   : > { %v466_v40 = vrot.slane %v465_v9, 4 }
  0xc6   : > { %v503_v31 = vrot.slane %v502_v54, 4 }
  0xc7   : > { %v467_v18 = vadd.f32 %v466_v40, %v465_v9 }
  0xc8   : > { %v504_v28 = vadd.f32 %v503_v31, %v502_v54  ;;  %v524_v31 = vshrl.u32 %v523_v57, 7 }
  0xc9   : > { %v468_v34 = vrot.slane %v467_v18, 2 }
  0xca   : > { %v505_v21 = vrot.slane %v504_v28, 2  ;;  %v525_v54 = vsub.s32 0, %v524_v31  ;;  %v529_v9 = vsub.s32 1, %v524_v31 }
  0xcb   : > { %v469_v0 = vadd.f32 %v468_v34, %v467_v18 }
  0xcc   : > { %v506_v26 = vadd.f32 %v505_v21, %v504_v28  ;;  %v521_v21 = vld [vmem:[%s2466_s1] sm:$0x3] }
  0xcd   : > { %v470_v6 = vrot.slane %v469_v0, 1  ;;  %v526_v34 = vrot.slane %v521_v21, %v525_v54  ;;  %v530_v63 = vrot.slane %v521_v21, %v529_v9 }
  0xce   : > { %v507_v15 = vrot.slane %v506_v26, 1 }
  0xcf   : > { %v471_v29 = vadd.f32 %v470_v6, %v469_v0  ;;  %v1569_v0 = vmov 1966171168  }
  0xd0   : > { %v508_v27 = vadd.f32 %v507_v15, %v506_v26  ;;  %v542_v26 = vunpack.c.l.s4 %v1569_v0 }
  0xd1   : > { %v511_v16 = vmul.f32 0.0051020407, %v471_v29 }
  0xd2   : > { %v512_v10 = vmul.f32 0.0051020407, %v508_v27  ;;  %v543_v24 = vunpack.c.0.s8 %v542_v26  ;;  %v535_v27 = vld [vmem:[%s2467_s2] sm:$0x3] }
  0xd3   : > { %v515_v22 = vsub.f32 %v511_v16, %v513_v37 }
  0xd4   : > { %v516_v25 = vsub.f32 %v512_v10, %v514_v23  ;;  %v546_v18 = vsub.s32 %v543_v24, %v524_v31 }
  0xd5   : > { %v517_v30 = vadd.f32 1e-05, %v515_v22 }
  0xd6   : > { %v518_v40 = vadd.f32 1e-05, %v516_v25 }
  0xd7   : > { %1430 = vrsqrt.f32 %v517_v30 }
  0xd8   : > { %1432 = vrsqrt.f32 %v518_v40 }
  0xe1   : > { %v1431_v39 = vpop.eup %1430 }
  0xe2   : > { %v1433_v32 = vpop.eup %1432  ;;  %v533_v35 = vmul.f32 %v1431_v39, %v526_v34 }
  0xe3   : > { %v534_v5 = vmul.f32 %v1433_v32, %v530_v63 }
  0xe4   : > { %v536_v11 = vmul.f32 %v533_v35, %v509_v38  ;;  %v2144_v6 = vrot.slane %v533_v35, %v525_v54 }
  0xe5   : > { %v537_v56 = vmul.f32 %v534_v5, %v510_v17  ;;  %v2146_v29 = vrot.slane %v534_v5, %v525_v54 }
  0xe6   : > { %v565_v23 = vmul.f32 %v2144_v6, %v1787_v43  ;;  %v597_v16 = vmul.f32 %v2144_v6, %v1925_v59  ;;  %v567_v57 = vmul.f32 %v2144_v6, %v1791_v45  ;;  %v599_v43 = vmul.f32 %v2144_v6, %v1939_v19 }
  0xe7   : > { %v540_v28 = vcombine.low %v536_v11, %v537_v56  ;;  %v566_v17 = vmul.f32 %v2146_v29, %v1789_v44  ;;  %v598_v10 = vmul.f32 %v2146_v29, %v1927_v60  ;;  %v568_v22 = vmul.f32 %v2146_v29, %v1793_v46 }
  0xe8   : > { %v600_v25 = vmul.f32 %v2146_v29, %v1941_v20  ;;  %v570_v59 = vmul.f32 %v2146_v29, %v1797_v48  ;;  %v602_v60 = vmul.f32 %v2146_v29, %v1951_v42  ;;  %v569_v45 = vmul.f32 %v2144_v6, %v1795_v47 }
  0xe9   : > { %v547_v15 = vrot.slane %v540_v28, %v546_v18  ;;  %v601_v46 = vmul.f32 %v2144_v6, %v1949_v36  ;;  %v572_v20 = vmul.f32 %v2146_v29, %v1805_v53  ;;  %v604_v19 = vmul.f32 %v2146_v29, %v1965_v14 }
  0xea   : > { %v571_v48 = vmul.f32 %v2144_v6, %v1803_v52  ;;  %v603_v63 = vmul.f32 %v2144_v6, %v1963_v13  ;;  %v574_v39 = vmul.f32 %v2146_v29, %v1815_v62  ;;  %v606_v35 = vmul.f32 %v2146_v29, %v1973_v7 }
  0xeb   : > { %v554_v37 = vrot.slane %v547_v15, %v546_v18  ;;  %v605_v7 = vmul.f32 %v2144_v6, %v1971_v33 }
  0xed   : > { %v556_v38 = vsub.f32 %v535_v27, %v554_v37  ;;  %v573_v27 = vmul.f32 %v2144_v6, %v1813_v61  ;;  %v576_v37 = vmul.f32 %v2146_v29, %v1821_v3  ;;  %v575_v3 = vmul.f32 %v2144_v6, %v1819_v2 }
  0xef   : > { %v2169_v30 = vrot.slane %v556_v38, %v525_v54  ;;  %v2171_v44 = vrot.slane %v556_v38, %v529_v9 }
  0xf1   : > { %v641_v40 = vadd.f32 %v2171_v44, %v566_v17  ;;  %v673_v31 = vadd.f32 %v2171_v44, %v598_v10  ;;  %v640_v42 = vadd.f32 %v2169_v30, %v565_v23  ;;  %v672_v47 = vadd.f32 %v2169_v30, %v597_v16 }
  0xf2   : > { %v643_v54 = vadd.f32 %v2171_v44, %v568_v22  ;;  %v675_v36 = vadd.f32 %v2171_v44, %v600_v25  ;;  %v642_v53 = vadd.f32 %v2169_v30, %v567_v57  ;;  %v674_v21 = vadd.f32 %v2169_v30, %v599_v43 }
  0xf3   : > { %v705_v14 = vmax.f32 %v641_v40, 0.0  ;;  %v737_v9 = vmax.f32 %v673_v31, 0.0  ;;  %v704_v0 = vmax.f32 %v640_v42, 0.0  ;;  %v736_v52 = vmax.f32 %v672_v47, 0.0  ;;  %v2553_v31 = vld [vmem:[#allocation13_spill] sm:$0xff]  ;;  %v2554_v47 = vld [vmem:[#allocation32_spill] sm:$0xff] }
  0xf4   : > { %v707_v26 = vmax.f32 %v643_v54, 0.0  ;;  %v739_v34 = vmax.f32 %v675_v36, 0.0  ;;  %v645_v24 = vadd.f32 %v2171_v44, %v570_v59  ;;  %v677_v32 = vadd.f32 %v2171_v44, %v602_v60 }
  0xf5   : > { %896 = vmatprep.mubr.f32.mxu0 %v705_v14  ;;  %992 = vmatprep.mubr.f32.mxu1 %v737_v9  ;;  %v706_v5 = vmax.f32 %v642_v53, 0.0  ;;  %v738_v11 = vmax.f32 %v674_v21, 0.0  ;;  %v644_v56 = vadd.f32 %v2169_v30, %v569_v45  ;;  %v676_v13 = vadd.f32 %v2169_v30, %v601_v46 }
  0xf6   : > { %897 = vmatmul.mubr.f32.vlgmr.msra.gmra.mrb[0].mxu0 %v704_v0  ;;  %993 = vmatmul.mubr.f32.vlgmr.msra.gmra.mrb[0].mxu1 %v736_v52  ;;  %v709_v62 = vmax.f32 %v645_v24, 0.0  ;;  %v741_v18 = vmax.f32 %v677_v32, 0.0  ;;  %v647_v28 = vadd.f32 %v2171_v44, %v572_v20  ;;  %v679_v15 = vadd.f32 %v2171_v44, %v604_v19  ;;  %v2557_v32 = vld [vmem:[#allocation15_spill] sm:$0xff] }
  0xf7   : > { %902 = vmatprep.mubr.f32.mxu0 %v707_v26  ;;  %998 = vmatprep.mubr.f32.mxu1 %v739_v34  ;;  %v608_v23 = vmul.f32 %v2146_v29, %v1985_v50  ;;  %v708_v16 = vmax.f32 %v644_v56, 0.0  ;;  %v740_v38 = vmax.f32 %v676_v13, 0.0  ;;  %v646_v17 = vadd.f32 %v2169_v30, %v571_v48  ;;  %v2555_v34 = vld [vmem:[#allocation12_spill] sm:$0xff] }
  0xf8   : > { %v678_v10 = vadd.f32 %v2169_v30, %v603_v63  ;;  %v711_v61 = vmax.f32 %v647_v28, 0.0  ;;  %v743_v57 = vmax.f32 %v679_v15, 0.0  ;;  %v649_v33 = vadd.f32 %v2171_v44, %v574_v39  ;;  %v2556_v39 = vld [vmem:[#allocation31_spill] sm:$0xff] }
  0xf9   : > { %v681_v22 = vadd.f32 %v2171_v44, %v606_v35  ;;  %v607_v50 = vmul.f32 %v2144_v6, %v1983_v41  ;;  %v578_v25 = vmul.f32 %v2146_v29, %v1831_v12  ;;  %v610_v43 = vmul.f32 %v2146_v29, %v1993_v4  ;;  %v2551_v12 = vld [vmem:[#allocation11_spill] sm:$0xff]  ;;  %v2552_v4 = vld [vmem:[#allocation30_spill] sm:$0xff] }
  0xfa   : > { %903 = vmatmul.mubr.f32.gmra.mrb[2].mxu0 %v706_v5  ;;  %999 = vmatmul.mubr.f32.gmra.mrb[2].mxu1 %v738_v11  ;;  %v710_v59 = vmax.f32 %v646_v17, 0.0  ;;  %v742_v60 = vmax.f32 %v678_v10, 0.0  ;;  %v648_v45 = vadd.f32 %v2169_v30, %v573_v27  ;;  %v680_v46 = vadd.f32 %v2169_v30, %v605_v7 }
  0xfb   : > { %908 = vmatprep.mubr.f32.mxu0 %v709_v62  ;;  %1004 = vmatprep.mubr.f32.mxu1 %v741_v18  ;;  %v713_v2 = vmax.f32 %v649_v33, 0.0  ;;  %v745_v20 = vmax.f32 %v681_v22, 0.0  ;;  %v651_v41 = vadd.f32 %v2171_v44, %v576_v37  ;;  %v683_v19 = vadd.f32 %v2171_v44, %v608_v23  ;;  %v2558_v37 = vld [vmem:[#allocation14_spill] sm:$0xff] }
  0xfc   : > { %v577_v48 = vmul.f32 %v2144_v6, %v2551_v12  ;;  %v609_v40 = vmul.f32 %v2144_v6, %v2552_v4  ;;  %v580_v42 = vmul.f32 %v2146_v29, %v2553_v31  ;;  %v612_v54 = vmul.f32 %v2146_v29, %v2554_v47 }
  0xfd   : > { %v712_v36 = vmax.f32 %v648_v45, 0.0  ;;  %v744_v53 = vmax.f32 %v680_v46, 0.0  ;;  %v650_v21 = vadd.f32 %v2169_v30, %v575_v3  ;;  %v682_v14 = vadd.f32 %v2169_v30, %v607_v50  ;;  %v2562_v45 = vld [vmem:[#allocation33_spill] sm:$0xff] }
  0xfe   : > { %909 = vmatmul.mubr.f32.gmra.mrb[4].mxu0 %v708_v16  ;;  %1005 = vmatmul.mubr.f32.gmra.mrb[4].mxu1 %v740_v38  ;;  %v715_v9 = vmax.f32 %v651_v41, 0.0  ;;  %v747_v0 = vmax.f32 %v683_v19, 0.0  ;;  %v653_v52 = vadd.f32 %v2171_v44, %v578_v25  ;;  %v685_v26 = vadd.f32 %v2171_v44, %v610_v43  ;;  %v2559_v16 = vld [vmem:[#allocation17_spill] sm:$0xff]  ;;  %v2563_v19 = vld [vmem:[#allocation19_spill] sm:$0xff] }
  0xff   : > { %914 = vmatprep.mubr.f32.mxu0 %v711_v61  ;;  %1010 = vmatprep.mubr.f32.mxu1 %v743_v57  ;;  %v579_v63 = vmul.f32 %v2144_v6, %v2555_v34  ;;  %v611_v24 = vmul.f32 %v2144_v6, %v2556_v39  ;;  %v582_v35 = vmul.f32 %v2146_v29, %v2557_v32  ;;  %v714_v11 = vmax.f32 %v650_v21, 0.0  ;;  %v2560_v57 = vld [vmem:[#allocation34_spill] sm:$0xff] }
 0x100   : > { %v614_v5 = vmul.f32 %v2146_v29, %v2013_v49  ;;  %v746_v56 = vmax.f32 %v682_v14, 0.0  ;;  %v652_v13 = vadd.f32 %v2169_v30, %v577_v48  ;;  %v684_v62 = vadd.f32 %v2169_v30, %v609_v40 }
 0x101   : > { %v717_v18 = vmax.f32 %v653_v52, 0.0  ;;  %v749_v28 = vmax.f32 %v685_v26, 0.0  ;;  %v655_v15 = vadd.f32 %v2171_v44, %v580_v42  ;;  %v687_v27 = vadd.f32 %v2171_v44, %v612_v54 }
 0x102   : > { %915 = vmatmul.mubr.f32.gmra.mrb[6].mxu0 %v710_v59  ;;  %1011 = vmatmul.mubr.f32.gmra.mrb[6].mxu1 %v742_v60  ;;  %v654_v7 = vadd.f32 %v2169_v30, %v579_v63  ;;  %v581_v49 = vmul.f32 %v2144_v6, %v2558_v37  ;;  %v613_v23 = vmul.f32 %v2144_v6, %v2011_v58  ;;  %v716_v17 = vmax.f32 %v652_v13, 0.0  ;;  %v2561_v59 = vld [vmem:[#allocation16_spill] sm:$0xff] }
 0x103   : > { %920 = vmatprep.mubr.f32.mxu0 %v713_v2  ;;  %1016 = vmatprep.mubr.f32.mxu1 %v745_v20  ;;  %v584_v38 = vmul.f32 %v2146_v29, %v2559_v16  ;;  %v748_v10 = vmax.f32 %v684_v62, 0.0  ;;  %v686_v61 = vadd.f32 %v2169_v30, %v611_v24  ;;  %v616_v33 = vmul.f32 %v2146_v29, %v2560_v57  ;;  %v2570_v16 = vld [vmem:[#allocation35_spill] sm:$0xff] }
 0x104   : > { %v719_v22 = vmax.f32 %v655_v15, 0.0  ;;  %v751_v3 = vmax.f32 %v687_v27, 0.0  ;;  %v657_v50 = vadd.f32 %v2171_v44, %v582_v35  ;;  %v689_v58 = vadd.f32 %v2171_v44, %v614_v5  ;;  %v2566_v35 = vld [vmem:[#allocation20_spill] sm:$0xff] }
 0x105   : > { %v718_v25 = vmax.f32 %v654_v7, 0.0  ;;  %v656_v43 = vadd.f32 %v2169_v30, %v581_v49  ;;  %v583_v60 = vmul.f32 %v2144_v6, %v2561_v59  ;;  %v615_v46 = vmul.f32 %v2144_v6, %v2562_v45  ;;  %v2568_v15 = vld [vmem:[#allocation36_spill] sm:$0xff]  ;;  %v2569_v49 = vld [vmem:[#allocation22_spill] sm:$0xff] }
 0x106   : > { %921 = vmatmul.mubr.f32.gmra.mrb[8].mxu0 %v712_v36  ;;  %1017 = vmatmul.mubr.f32.gmra.mrb[8].mxu1 %v744_v53  ;;  %v750_v2 = vmax.f32 %v686_v61, 0.0  ;;  %v688_v20 = vadd.f32 %v2169_v30, %v613_v23  ;;  %v659_v41 = vadd.f32 %v2171_v44, %v584_v38  ;;  %v586_v12 = vmul.f32 %v2146_v29, %v2563_v19  ;;  %v2564_v36 = vld [vmem:[#allocation18_spill] sm:$0xff]  ;;  %v2571_v61 = vld [vmem:[#allocation25_spill] sm:$0xff]  ;;  %v2575_v19 = vld [vmem:[#allocation27_spill] sm:$0xff] }
 0x107   : > { %926 = vmatprep.mubr.f32.mxu0 %v715_v9  ;;  %1022 = vmatprep.mubr.f32.mxu1 %v747_v0  ;;  %v721_v48 = vmax.f32 %v657_v50, 0.0  ;;  %v753_v4 = vmax.f32 %v689_v58, 0.0  ;;  %v691_v40 = vadd.f32 %v2171_v44, %v616_v33  ;;  %v618_v31 = vmul.f32 %v2146_v29, %v2033_v8  ;;  %v2565_v0 = vld [vmem:[#allocation21_spill] sm:$0xff]  ;;  %v2572_v50 = vld [vmem:[#allocation38_spill] sm:$0xff] }
 0x108   : > { %v720_v42 = vmax.f32 %v656_v43, 0.0  ;;  %v658_v47 = vadd.f32 %v2169_v30, %v583_v60  ;;  %v690_v54 = vadd.f32 %v2169_v30, %v615_v46  ;;  %v585_v53 = vmul.f32 %v2144_v6, %v2564_v36  ;;  %v2573_v60 = vld [vmem:[#allocation24_spill] sm:$0xff] }
 0x109   : > { %v752_v21 = vmax.f32 %v688_v20, 0.0  ;;  %v661_v14 = vadd.f32 %v2171_v44, %v586_v12  ;;  %v617_v9 = vmul.f32 %v2144_v6, %v2031_v51  ;;  %v588_v52 = vmul.f32 %v2146_v29, %v2565_v0  ;;  %v2574_v20 = vld [vmem:[#allocation37_spill] sm:$0xff] }
 0x10a   : > { %927 = vmatmul.mubr.f32.gmra.mrb[10].mxu0 %v714_v11  ;;  %1023 = vmatmul.mubr.f32.gmra.mrb[10].mxu1 %v746_v56  ;;  %v723_v8 = vmax.f32 %v659_v41, 0.0  ;;  %v755_v26 = vmax.f32 %v691_v40, 0.0  ;;  %v693_v34 = vadd.f32 %v2171_v44, %v618_v31  ;;  %v620_v63 = vmul.f32 %v2146_v29, %v2043_v55  ;;  %v2576_v31 = vld [vmem:[#allocation40_spill] sm:$0xff] }
 0x10b   : > { %932 = vmatprep.mubr.f32.mxu0 %v717_v18  ;;  %1028 = vmatprep.mubr.f32.mxu1 %v749_v28  ;;  %v722_v39 = vmax.f32 %v658_v47, 0.0  ;;  %v754_v24 = vmax.f32 %v690_v54, 0.0  ;;  %v660_v32 = vadd.f32 %v2169_v30, %v585_v53  ;;  %v587_v5 = vmul.f32 %v2144_v6, %v2566_v35  ;;  %v2567_v18 = vld [vmem:[#allocation23_spill] sm:$0xff]  ;;  %v2577_v53 = vld [vmem:[#allocation26_spill] sm:$0xff] }
 0x10c   : > { %v725_v51 = vmax.f32 %v661_v14, 0.0  ;;  %v692_v11 = vadd.f32 %v2169_v30, %v617_v9  ;;  %v663_v56 = vadd.f32 %v2171_v44, %v588_v52  ;;  %v619_v13 = vmul.f32 %v2144_v6, %v2041_v1  ;;  %v2578_v52 = vld [vmem:[#allocation39_spill] sm:$0xff] }
 0x10d   : > { %v757_v55 = vmax.f32 %v693_v34, 0.0  ;;  %v695_v62 = vadd.f32 %v2171_v44, %v620_v63  ;;  %v590_v28 = vmul.f32 %v2146_v29, %v2567_v18  ;;  %v622_v27 = vmul.f32 %v2146_v29, %v2568_v15  ;;  %v2579_v63 = vld [vmem:[#allocation29_spill] sm:$0xff] }
 0x10e   : > { %933 = vmatmul.mubr.f32.gmra.mrb[12].mxu0 %v716_v17  ;;  %1029 = vmatmul.mubr.f32.gmra.mrb[12].mxu1 %v748_v10  ;;  %v724_v7 = vmax.f32 %v660_v32, 0.0  ;;  %v662_v37 = vadd.f32 %v2169_v30, %v587_v5  ;;  %v589_v23 = vmul.f32 %v2144_v6, %v2569_v49  ;;  %v621_v1 = vmul.f32 %v2144_v6, %v2570_v16 }
 0x10f   : > { %938 = vmatprep.mubr.f32.mxu0 %v719_v22  ;;  %1034 = vmatprep.mubr.f32.mxu1 %v751_v3  ;;  %v756_v38 = vmax.f32 %v692_v11, 0.0  ;;  %v727_v17 = vmax.f32 %v663_v56, 0.0  ;;  %v694_v10 = vadd.f32 %v2169_v30, %v619_v13  ;;  %v592_v57 = vmul.f32 %v2146_v29, %v2571_v61  ;;  %v2581_v56 = vld [vmem:[#allocation28_spill] sm:$0xff] }
 0x110   : > { %v759_v33 = vmax.f32 %v695_v62, 0.0  ;;  %v665_v22 = vadd.f32 %v2171_v44, %v590_v28  ;;  %v697_v3 = vadd.f32 %v2171_v44, %v622_v27  ;;  %v624_v58 = vmul.f32 %v2146_v29, %v2572_v50 }
 0x111   : > { %v664_v43 = vadd.f32 %v2169_v30, %v589_v23  ;;  %v696_v59 = vadd.f32 %v2169_v30, %v621_v1  ;;  %v591_v45 = vmul.f32 %v2144_v6, %v2573_v60  ;;  %v758_v46 = vmax.f32 %v694_v10, 0.0 }
 0x112   : > { %939 = vmatmul.mubr.f32.gmra.mrb[14].mxu0 %v718_v25  ;;  %1035 = vmatmul.mubr.f32.gmra.mrb[14].mxu1 %v750_v2  ;;  %v726_v25 = vmax.f32 %v662_v37, 0.0  ;;  %v667_v2 = vadd.f32 %v2171_v44, %v592_v57  ;;  %v623_v41 = vmul.f32 %v2144_v6, %v2574_v20  ;;  %v594_v12 = vmul.f32 %v2146_v29, %v2575_v19 }
 0x113   : > { %944 = vmatprep.mubr.f32.mxu0 %v721_v48  ;;  %1040 = vmatprep.mubr.f32.mxu1 %v753_v4  ;;  %v729_v48 = vmax.f32 %v665_v22, 0.0  ;;  %v761_v4 = vmax.f32 %v697_v3, 0.0  ;;  %v699_v40 = vadd.f32 %v2171_v44, %v624_v58  ;;  %v728_v47 = vmax.f32 %v664_v43, 0.0 }
 0x114   : > { %v760_v54 = vmax.f32 %v696_v59, 0.0  ;;  %v666_v36 = vadd.f32 %v2169_v30, %v591_v45  ;;  %v731_v14 = vmax.f32 %v667_v2, 0.0  ;;  %v698_v9 = vadd.f32 %v2169_v30, %v623_v41 }
 0x115   : > { %v669_v0 = vadd.f32 %v2171_v44, %v594_v12  ;;  %v595_v13 = vmul.f32 %v2144_v6, %v2581_v56 }
 0x116   : > { %945 = vmatmul.mubr.f32.gmra.mrb[16].mxu0 %v720_v42  ;;  %1041 = vmatmul.mubr.f32.gmra.mrb[16].mxu1 %v752_v21  ;;  %v626_v42 = vmul.f32 %v2146_v29, %v2576_v31  ;;  %v593_v21 = vmul.f32 %v2144_v6, %v2577_v53  ;;  %v730_v35 = vmax.f32 %v666_v36, 0.0 }
 0x117   : > { %950 = vmatprep.mubr.f32.mxu0 %v723_v8  ;;  %1046 = vmatprep.mubr.f32.mxu1 %v755_v26  ;;  %v625_v8 = vmul.f32 %v2144_v6, %v2578_v52  ;;  %v763_v26 = vmax.f32 %v699_v40, 0.0  ;;  %v733_v18 = vmax.f32 %v669_v0, 0.0  ;;  %v670_v37 = vadd.f32 %v2169_v30, %v595_v13 }
 0x118   : > { %v701_v34 = vadd.f32 %v2171_v44, %v626_v42  ;;  %v668_v5 = vadd.f32 %v2169_v30, %v593_v21 }
 0x119   : > { %v700_v11 = vadd.f32 %v2169_v30, %v625_v8  ;;  %v734_v16 = vmax.f32 %v670_v37, 0.0 }
 0x11a   : > { %951 = vmatmul.mubr.f32.gmra.mrb[18].mxu0 %v722_v39  ;;  %1047 = vmatmul.mubr.f32.gmra.mrb[18].mxu1 %v754_v24  ;;  %v596_v39 = vmul.f32 %v2146_v29, %v2579_v63  ;;  %v2580_v24 = vld [vmem:[#allocation42_spill] sm:$0xff]  ;;  %v765_v28 = vmax.f32 %v701_v34, 0.0  ;;  %v732_v27 = vmax.f32 %v668_v5, 0.0 }
 0x11b   : > { %956 = vmatprep.mubr.f32.mxu0 %v725_v51  ;;  %1052 = vmatprep.mubr.f32.mxu1 %v757_v55  ;;  %v628_v32 = vmul.f32 %v2146_v29, %v2580_v24  ;;  %v762_v51 = vmax.f32 %v698_v9, 0.0  ;;  %v2582_v55 = vld [vmem:[#allocation41_spill] sm:$0xff] }
 0x11c   : > { %v627_v62 = vmul.f32 %v2144_v6, %v2582_v55  ;;  %v671_v29 = vadd.f32 %v2171_v44, %v596_v39 }
 0x11d   : > { %v703_v15 = vadd.f32 %v2171_v44, %v628_v32 }
 0x11e   : > { %957 = vmatmul.mubr.f32.gmra.mrb[20].mxu0 %v724_v7  ;;  %1053 = vmatmul.mubr.f32.gmra.mrb[20].mxu1 %v756_v38  ;;  %v764_v7 = vmax.f32 %v700_v11, 0.0  ;;  %v702_v49 = vadd.f32 %v2169_v30, %v627_v62  ;;  %v735_v6 = vmax.f32 %v671_v29, 0.0 }
 0x11f   : > { %962 = vmatprep.mubr.f32.mxu0 %v727_v17  ;;  %1058 = vmatprep.mubr.f32.mxu1 %v759_v33  ;;  %v767_v23 = vmax.f32 %v703_v15, 0.0 }
 0x120   : > { %v766_v1 = vmax.f32 %v702_v49, 0.0 }
 0x122   : > { %963 = vmatmul.mubr.f32.gmra.mrb[22].mxu0 %v726_v25  ;;  %1059 = vmatmul.mubr.f32.gmra.mrb[22].mxu1 %v758_v46 }
 0x123   : > { %968 = vmatprep.mubr.f32.mxu0 %v729_v48  ;;  %1064 = vmatprep.mubr.f32.mxu1 %v761_v4 }
 0x126   : > { %969 = vmatmul.mubr.f32.gmra.mrb[24].mxu0 %v728_v47  ;;  %1065 = vmatmul.mubr.f32.gmra.mrb[24].mxu1 %v760_v54 }
 0x127   : > { %974 = vmatprep.mubr.f32.mxu0 %v731_v14  ;;  %1070 = vmatprep.mubr.f32.mxu1 %v763_v26 }
 0x12a   : > { %975 = vmatmul.mubr.f32.gmra.mrb[26].mxu0 %v730_v35  ;;  %1071 = vmatmul.mubr.f32.gmra.mrb[26].mxu1 %v762_v51 }
 0x12b   : > { %980 = vmatprep.mubr.f32.mxu0 %v733_v18  ;;  %1076 = vmatprep.mubr.f32.mxu1 %v765_v28 }
 0x12e   : > { %981 = vmatmul.mubr.f32.gmra.mrb[28].mxu0 %v732_v27  ;;  %1077 = vmatmul.mubr.f32.gmra.mrb[28].mxu1 %v764_v7 }
 0x12f   : > { %986 = vmatprep.mubr.f32.mxu0 %v735_v6  ;;  %1082 = vmatprep.mubr.f32.mxu1 %v767_v23 }
 0x132   : > { %987 = vmatmul.mubr.f32.gmra.mrb[30].mxu0 %v734_v16  ;;  %1083 = vmatmul.mubr.f32.gmra.mrb[30].mxu1 %v766_v1 }
 0x1c9   : > { %v898_v44 = vpop.f32.mrb[0].mxu0  ;;  %v994_v38 = vpop.f32.mrb[0].mxu1 }
 0x1ca   : > { %1089 = vst [vmem:[%s2349_s25] sm:$0xff] %v898_v44  ;;  %1121 = vst [vmem:[%s2349_s25 + $0x100] sm:$0xff] %v994_v38  ;;  %v900_v30 = vpop.f32.mrb[1].mxu0  ;;  %v996_v17 = vpop.f32.mrb[1].mxu1 }
 0x1cb   : > { %1090 = vst [vmem:[%s2349_s25 + $0x8] sm:$0xff] %v900_v30  ;;  %1122 = vst [vmem:[%s2349_s25 + $0x108] sm:$0xff] %v996_v17 }
 0x1cd   : > { %v904_v10 = vpop.f32.mrb[2].mxu0  ;;  %v1000_v61 = vpop.f32.mrb[2].mxu1 }
 0x1ce   : > { %1091 = vst [vmem:[%s2349_s25 + $0x10] sm:$0xff] %v904_v10  ;;  %1123 = vst [vmem:[%s2349_s25 + $0x110] sm:$0xff] %v1000_v61  ;;  %v906_v57 = vpop.f32.mrb[3].mxu0  ;;  %v1002_v33 = vpop.f32.mrb[3].mxu1 }
 0x1cf   : > { %1092 = vst [vmem:[%s2349_s25 + $0x18] sm:$0xff] %v906_v57  ;;  %1124 = vst [vmem:[%s2349_s25 + $0x118] sm:$0xff] %v1002_v33 }
 0x1d1   : > { %v910_v22 = vpop.f32.mrb[4].mxu0  ;;  %v1006_v3 = vpop.f32.mrb[4].mxu1 }
 0x1d2   : > { %1093 = vst [vmem:[%s2349_s25 + $0x20] sm:$0xff] %v910_v22  ;;  %1125 = vst [vmem:[%s2349_s25 + $0x120] sm:$0xff] %v1006_v3  ;;  %v912_v50 = vpop.f32.mrb[5].mxu0  ;;  %v1008_v58 = vpop.f32.mrb[5].mxu1 }
 0x1d3   : > { %1094 = vst [vmem:[%s2349_s25 + $0x28] sm:$0xff] %v912_v50  ;;  %1126 = vst [vmem:[%s2349_s25 + $0x128] sm:$0xff] %v1008_v58 }
 0x1d5   : > { %v916_v25 = vpop.f32.mrb[6].mxu0  ;;  %v1012_v43 = vpop.f32.mrb[6].mxu1 }
 0x1d6   : > { %1095 = vst [vmem:[%s2349_s25 + $0x30] sm:$0xff] %v916_v25  ;;  %1127 = vst [vmem:[%s2349_s25 + $0x130] sm:$0xff] %v1012_v43  ;;  %v918_v59 = vpop.f32.mrb[7].mxu0  ;;  %v1014_v60 = vpop.f32.mrb[7].mxu1 }
 0x1d7   : > { %1096 = vst [vmem:[%s2349_s25 + $0x38] sm:$0xff] %v918_v59  ;;  %1128 = vst [vmem:[%s2349_s25 + $0x138] sm:$0xff] %v1014_v60 }
 0x1d9   : > { %v922_v45 = vpop.f32.mrb[8].mxu0  ;;  %v1018_v46 = vpop.f32.mrb[8].mxu1 }
 0x1da   : > { %1097 = vst [vmem:[%s2349_s25 + $0x40] sm:$0xff] %v922_v45  ;;  %1129 = vst [vmem:[%s2349_s25 + $0x140] sm:$0xff] %v1018_v46  ;;  %v924_v2 = vpop.f32.mrb[9].mxu0  ;;  %v1020_v20 = vpop.f32.mrb[9].mxu1 }
 0x1db   : > { %1098 = vst [vmem:[%s2349_s25 + $0x48] sm:$0xff] %v924_v2  ;;  %1130 = vst [vmem:[%s2349_s25 + $0x148] sm:$0xff] %v1020_v20 }
 0x1dd   : > { %v928_v41 = vpop.f32.mrb[10].mxu0  ;;  %v1024_v19 = vpop.f32.mrb[10].mxu1 }
 0x1de   : > { %1099 = vst [vmem:[%s2349_s25 + $0x50] sm:$0xff] %v928_v41  ;;  %1131 = vst [vmem:[%s2349_s25 + $0x150] sm:$0xff] %v1024_v19  ;;  %v930_v12 = vpop.f32.mrb[11].mxu0  ;;  %v1026_v48 = vpop.f32.mrb[11].mxu1 }
 0x1df   : > { %1100 = vst [vmem:[%s2349_s25 + $0x58] sm:$0xff] %v930_v12  ;;  %1132 = vst [vmem:[%s2349_s25 + $0x158] sm:$0xff] %v1026_v48 }
 0x1e1   : > { %v934_v4 = vpop.f32.mrb[12].mxu0  ;;  %v1030_v40 = vpop.f32.mrb[12].mxu1 }
 0x1e2   : > { %1101 = vst [vmem:[%s2349_s25 + $0x60] sm:$0xff] %v934_v4  ;;  %1133 = vst [vmem:[%s2349_s25 + $0x160] sm:$0xff] %v1030_v40  ;;  %v936_v31 = vpop.f32.mrb[13].mxu0  ;;  %v1032_v42 = vpop.f32.mrb[13].mxu1 }
 0x1e3   : > { %1102 = vst [vmem:[%s2349_s25 + $0x68] sm:$0xff] %v936_v31  ;;  %1134 = vst [vmem:[%s2349_s25 + $0x168] sm:$0xff] %v1032_v42 }
 0x1e5   : > { %v940_v47 = vpop.f32.mrb[14].mxu0  ;;  %v1036_v54 = vpop.f32.mrb[14].mxu1 }
 0x1e6   : > { %1103 = vst [vmem:[%s2349_s25 + $0x70] sm:$0xff] %v940_v47  ;;  %1135 = vst [vmem:[%s2349_s25 + $0x170] sm:$0xff] %v1036_v54  ;;  %v942_v36 = vpop.f32.mrb[15].mxu0  ;;  %v1038_v53 = vpop.f32.mrb[15].mxu1 }
 0x1e7   : > { %1104 = vst [vmem:[%s2349_s25 + $0x78] sm:$0xff] %v942_v36  ;;  %1136 = vst [vmem:[%s2349_s25 + $0x178] sm:$0xff] %v1038_v53 }
 0x1e9   : > { %v946_v21 = vpop.f32.mrb[16].mxu0  ;;  %v1042_v14 = vpop.f32.mrb[16].mxu1 }
 0x1ea   : > { %1105 = vst [vmem:[%s2349_s25 + $0x80] sm:$0xff] %v946_v21  ;;  %1137 = vst [vmem:[%s2349_s25 + $0x180] sm:$0xff] %v1042_v14  ;;  %v948_v9 = vpop.f32.mrb[17].mxu0  ;;  %v1044_v0 = vpop.f32.mrb[17].mxu1 }
 0x1eb   : > { %1106 = vst [vmem:[%s2349_s25 + $0x88] sm:$0xff] %v948_v9  ;;  %1138 = vst [vmem:[%s2349_s25 + $0x188] sm:$0xff] %v1044_v0 }
 0x1ed   : > { %v952_v52 = vpop.f32.mrb[18].mxu0  ;;  %v1048_v8 = vpop.f32.mrb[18].mxu1 }
 0x1ee   : > { %1107 = vst [vmem:[%s2349_s25 + $0x90] sm:$0xff] %v952_v52  ;;  %1139 = vst [vmem:[%s2349_s25 + $0x190] sm:$0xff] %v1048_v8  ;;  %v954_v26 = vpop.f32.mrb[19].mxu0  ;;  %v1050_v34 = vpop.f32.mrb[19].mxu1 }
 0x1ef   : > { %1108 = vst [vmem:[%s2349_s25 + $0x98] sm:$0xff] %v954_v26  ;;  %1140 = vst [vmem:[%s2349_s25 + $0x198] sm:$0xff] %v1050_v34 }
 0x1f1   : > { %v958_v63 = vpop.f32.mrb[20].mxu0  ;;  %v1054_v39 = vpop.f32.mrb[20].mxu1 }
 0x1f2   : > { %1109 = vst [vmem:[%s2349_s25 + $0xa0] sm:$0xff] %v958_v63  ;;  %1141 = vst [vmem:[%s2349_s25 + $0x1a0] sm:$0xff] %v1054_v39  ;;  %v960_v24 = vpop.f32.mrb[21].mxu0  ;;  %v1056_v32 = vpop.f32.mrb[21].mxu1 }
 0x1f3   : > { %1110 = vst [vmem:[%s2349_s25 + $0xa8] sm:$0xff] %v960_v24  ;;  %1142 = vst [vmem:[%s2349_s25 + $0x1a8] sm:$0xff] %v1056_v32 }
 0x1f5   : > { %v964_v35 = vpop.f32.mrb[22].mxu0  ;;  %v1060_v5 = vpop.f32.mrb[22].mxu1 }
 0x1f6   : > { %1111 = vst [vmem:[%s2349_s25 + $0xb0] sm:$0xff] %v964_v35  ;;  %1143 = vst [vmem:[%s2349_s25 + $0x1b0] sm:$0xff] %v1060_v5  ;;  %v966_v51 = vpop.f32.mrb[23].mxu0  ;;  %v1062_v11 = vpop.f32.mrb[23].mxu1 }
 0x1f7   : > { %1112 = vst [vmem:[%s2349_s25 + $0xb8] sm:$0xff] %v966_v51  ;;  %1144 = vst [vmem:[%s2349_s25 + $0x1b8] sm:$0xff] %v1062_v11 }
 0x1f9   : > { %v970_v56 = vpop.f32.mrb[24].mxu0  ;;  %v1066_v13 = vpop.f32.mrb[24].mxu1 }
 0x1fa   : > { %1113 = vst [vmem:[%s2349_s25 + $0xc0] sm:$0xff] %v970_v56  ;;  %1145 = vst [vmem:[%s2349_s25 + $0x1c0] sm:$0xff] %v1066_v13  ;;  %v972_v55 = vpop.f32.mrb[25].mxu0  ;;  %v1068_v62 = vpop.f32.mrb[25].mxu1 }
 0x1fb   : > { %1114 = vst [vmem:[%s2349_s25 + $0xc8] sm:$0xff] %v972_v55  ;;  %1146 = vst [vmem:[%s2349_s25 + $0x1c8] sm:$0xff] %v1068_v62 }
 0x1fd   : > { %v976_v18 = vpop.f32.mrb[26].mxu0  ;;  %v1072_v28 = vpop.f32.mrb[26].mxu1 }
 0x1fe   : > { %1115 = vst [vmem:[%s2349_s25 + $0xd0] sm:$0xff] %v976_v18  ;;  %1147 = vst [vmem:[%s2349_s25 + $0x1d0] sm:$0xff] %v1072_v28  ;;  %v978_v29 = vpop.f32.mrb[27].mxu0  ;;  %v1074_v15 = vpop.f32.mrb[27].mxu1 }
 0x1ff   : > { %1116 = vst [vmem:[%s2349_s25 + $0xd8] sm:$0xff] %v978_v29  ;;  %1148 = vst [vmem:[%s2349_s25 + $0x1d8] sm:$0xff] %v1074_v15 }
 0x201   : > { %v982_v27 = vpop.f32.mrb[28].mxu0  ;;  %v1078_v7 = vpop.f32.mrb[28].mxu1 }
 0x202   : > { %1117 = vst [vmem:[%s2349_s25 + $0xe0] sm:$0xff] %v982_v27  ;;  %1149 = vst [vmem:[%s2349_s25 + $0x1e0] sm:$0xff] %v1078_v7  ;;  %v984_v37 = vpop.f32.mrb[29].mxu0  ;;  %v1080_v49 = vpop.f32.mrb[29].mxu1 }
 0x203   : > { %1118 = vst [vmem:[%s2349_s25 + $0xe8] sm:$0xff] %v984_v37  ;;  %1150 = vst [vmem:[%s2349_s25 + $0x1e8] sm:$0xff] %v1080_v49 }
 0x205   : > { %v988_v6 = vpop.f32.mrb[30].mxu0  ;;  %v1084_v23 = vpop.f32.mrb[30].mxu1 }
 0x206   : > { %1119 = vst [vmem:[%s2349_s25 + $0xf0] sm:$0xff] %v988_v6  ;;  %1151 = vst [vmem:[%s2349_s25 + $0x1f0] sm:$0xff] %v1084_v23  ;;  %v990_v16 = vpop.f32.mrb[31].mxu0  ;;  %v1086_v1 = vpop.f32.mrb[31].mxu1 }
 0x207   : > { %1120 = vst [vmem:[%s2349_s25 + $0xf8] sm:$0xff] %v990_v16  ;;  %1152 = vst [vmem:[%s2349_s25 + $0x1f8] sm:$0xff] %v1086_v1 }
 0x208   : > { %1505 = shalt.err (!%p1502_p11)
}
 0x209   : > { %s1506_s11 = scalar_lea.hbm %s2416_s10, 8192  ;;  %s1510_s29 = scalar_lea.hbm %s2469_s4, 32768 }
 0x20a   : > { %p1507_p13 = scmp.ne.s32.totalorder %s2416_s10, %s1506_s11  ;;  %p1511_p12 = scmp.lt.u32.totalorder %s2416_s10, %s2469_s4 }
 0x20b   : > { %p1512_p7 = scmp.lt.u32.totalorder %s1510_s29, %s1506_s11  ;;  %p1514_p8 = scmp.lt.u32.totalorder %s1506_s11, %s2416_s10 }
 0x20c   : > { %p1508_p2 = pnand %p1507_p13, %p2583_p9 }
 0x20d   : > { %p1513_p3 = por %p1512_p7, %p1511_p12 }
 0x20e   : > { %p1509_p6 = pneg %p1508_p2 }
 0x20f   : > { %p1515_p10 = por %p1514_p8, %p1513_p3 }
 0x211   : > { %p1516_p1 = pnand %p1515_p10, %p1509_p6 }
 0x213   : > { %1519 = shalt.err (!%p1516_p1)
}
 0x214   : > { %s1571_s25 = smov 256   ;;  %s1572_s14 = smov 1024  }
 0x215   : > { %s1573_s13 = smov 16  }
 0x216   : > { %1372 = dma.vmem_to_hbm [thread:$0]  (%p2583_p9), %s2418_s12, 8192, %s2416_s10, %s1154_s19, %s1571_s25, %s1572_s14, %s1573_s13  }
 0x217 PF: > { %p1389_p4 = scmp.ge.s32.totalorder %s1562_s18, 2  ;;  %s1182_s7 = sand.u32 1, %s1550_s15  }
 0x218   : > { %p2584_p0 = scmp.ne.s32.totalorder %s2509_s28, 0  ;;  %s1183_s5 = scalar_lea.sflag [#allocation4], %s1182_s7 }
 0x21a   : > { %p1383_p5 = pnand %p1389_p4, %p2584_p0 }
 0x21c   : > { %1545 = dma.done.wait (!%p1383_p5), %s1183_s5, 8192  }
 0x21d   : > { %1547 = vsyncadd (!%p1383_p5), %s1183_s5, 4294959104  ;;  %p18_p11 = scmp.ge.s32.totalorder %s1624_s21, 6   ;;  %s2585_s15 = smov %s1554_s16 }
 0x21e   : > { %s2586_s16 = smov %s1558_s17  ;;  %s2587_s17 = smov %s1636_s24 }
 0x21f   : > { %s2588_s18 = smov %s1624_s21  ;;  %20 = sbr.rel (!%p18_p11) target bundleno = 6 (0x6), region = 86 }
 0x226   :  { %1188 = vsyncpa [#allocation3], 1 }
 0x227   :  { %1190 = vsyncpa [#allocation3 + $0x1], 1 }
 0x228   :  { %1191 = vsyncpa [#allocation6], 1 }
 0x229   :  { %1193 = vsyncpa [#allocation6 + $0x1], 1 }
 0x22a   :  { %1194 = vsyncpa [#allocation4], 1 }
 0x22b   :  { %1196 = vsyncpa [#allocation4 + $0x1], 1 }

</bundles_post_ra>
